<compile_context>
chip_gen: v5e
topology: v5e:2x2
jax: 0.10.0
libtpu: 0.0.40
codegen_flags: <defaults>
</compile_context>

<pallas_src>
import jax
import jax.numpy as jnp
from jax import lax
from jax.experimental import pallas as pl
from jax.experimental.pallas import tpu as pltpu


def cnnnet_kernel(x_ref, w1_ref, b1_ref, w2_ref, b2_ref, o_ref):
    # x_ref: (TB, C*768)  w1_ref: (C*768, C)  b1_ref: (1, C)
    # w2_ref: (C, 2)      b2_ref: (1, 2)      o_ref: (TB, 2)

    # linear1 + ReLU. bf16 MXU inputs with f32 accumulation (HBM-side arrays stay
    # f32); this is the declared matmul precision and avoids multi-pass f32 MXU
    # work that would make v5e compute-bound.
    x = x_ref[...].astype(jnp.bfloat16)
    w1 = w1_ref[...].astype(jnp.bfloat16)
    h = jnp.dot(x, w1, preferred_element_type=jnp.float32) + b1_ref[...]
    h = jnp.maximum(h, 0.0)

    # Dropout(p=0.5): identity in eval/inference mode.
    # TODO(synk): training-mode dropout would need pltpu.prng_seed + stateful_bernoulli.

    # 2-class softmax == sigmoid of the logit difference:
    #   softmax([l0, l1]) = [sigmoid(l0 - l1), sigmoid(l1 - l0)]
    # Removes the lane-sparse (TB,2) logits, both XLU reductions and one exp.
    w2d = w2_ref[:, 1:2] - w2_ref[:, 0:1]                           # (C, 1)
    b2d = b2_ref[:, 1:2] - b2_ref[:, 0:1]                           # (1, 1)
    d = jnp.dot(h, w2d, preferred_element_type=jnp.float32) + b2d   # (TB, 1)

    # Numerically-safe sigmoid pair: exp argument is always <= 0, so even padded
    # tail-tile garbage rows cannot overflow (their rows are discarded anyway).
    e = jnp.exp(-jnp.abs(d))
    inv = 1.0 / (1.0 + e)        # exact reciprocal (HBM-bound kernel -> free)
    p_hi = inv                   # probability of the larger logit
    p_lo = e * inv               # probability of the smaller logit
    pos = d >= 0.0
    p0 = jnp.where(pos, p_lo, p_hi)   # P(class 0)
    p1 = jnp.where(pos, p_hi, p_lo)   # P(class 1)

    cols = lax.broadcasted_iota(jnp.int32, o_ref.shape, 1)
    o_ref[...] = jnp.where(cols == 0, p0, p1).astype(o_ref.dtype)


def _round_up(v, m):
    return ((v + m - 1) // m) * m


def _pick_batch_tile(B, tb_cap):
    """Balanced, 8-aligned batch tiles with an even tile count (>=2) for v7x megacore."""
    if B <= 8:
        return B                      # single full-extent tile (sidesteps 8-row rule)
    n = max(2, pl.cdiv(B, tb_cap))    # at least 2 grid steps so both TCs get work
    if n % 2:
        n += 1                        # even tile count balances the 2-core split
    return min(_round_up(pl.cdiv(B, n), 8), tb_cap)


def cnnnet_forward(x, w1, b1, w2, b2, *, tb_cap=None):
    """x: (B, C, 768) float32 -> (B, 2) float32 softmax probabilities."""
    B = x.shape[0]
    in1, C = w1.shape            # (C*768, C)
    x2d = x.reshape(B, -1)       # == torch x.view(x.shape[0], -1)
    b1_2d = b1.reshape(1, -1)
    b2_2d = b2.reshape(1, -1)

    # TODO(synk): if the accuracy budget allows, store/feed x in bf16 to halve the
    # dominant HBM stream (kernel is ~2 flops/byte, HBM-bound on x).

    if tb_cap is None:
        # 2048-row x tiles (2 x 24 MiB double-buffered + w1) only fit v5e/v6e's
        # 128 MiB VMEM; v7x (64 MiB per TC) stays at 1024. Gate on reported VMEM
        # capacity instead of hardcoding per chip.
        try:
            vmem_cap = pltpu.get_tpu_info().vmem_capacity_bytes
        except Exception:
            vmem_cap = 64 * 1024 * 1024   # conservative (v7x per-TC)
        tb_cap = 2048 if vmem_cap >= 100 * 1024 * 1024 else 1024
    vmem_limit = (96 if tb_cap >= 2048 else 48) * 1024 * 1024

    TB = _pick_batch_tile(B, tb_cap)
    grid = (pl.cdiv(B, TB),)

    flops = 2 * B * in1 * C + 2 * B * C          # linear1 + logit-difference dot
    bytes_accessed = 4 * (B * in1 + in1 * C + C + C * 2 + 2 + B * 2)
    cost = pl.CostEstimate(flops=flops, transcendentals=B,
                           bytes_accessed=bytes_accessed)

    return pl.pallas_call(
        cnnnet_kernel,
        out_shape=jax.ShapeDtypeStruct((B, 2), jnp.float32),
        grid=grid,
        in_specs=[
            pl.BlockSpec((TB, in1), lambda i: (i, 0)),   # x: batch-tiled, double-buffered
            pl.BlockSpec((in1, C), lambda i: (0, 0)),    # w1: resident across tiles
            pl.BlockSpec((1, C), lambda i: (0, 0)),      # b1: resident
            pl.BlockSpec((C, 2), lambda i: (0, 0)),      # w2: resident
            pl.BlockSpec((1, 2), lambda i: (0, 0)),      # b2: resident
        ],
        out_specs=pl.BlockSpec((TB, 2), lambda i: (i, 0)),
        compiler_params=pltpu.CompilerParams(
            dimension_semantics=("parallel",),
            vmem_limit_bytes=vmem_limit,
        ),
        cost_estimate=cost,
    )(x2d, w1, b1_2d, w2, b2_2d)


def init_params(input_channel, key):
    """PyTorch-shaped init; weights stored as (in, out) so the kernel does x @ W."""
    k1, k2, k3, k4 = jax.random.split(key, 4)
    in1 = input_channel * 768
    bound1 = 1.0 / (in1 ** 0.5)
    bound2 = 1.0 / (input_channel ** 0.5)
    w1 = jax.random.uniform(k1, (in1, input_channel), jnp.float32,
                            minval=-bound1, maxval=bound1)
    b1 = jax.random.uniform(k2, (input_channel,), jnp.float32,
                            minval=-bound1, maxval=bound1)
    w2 = jax.random.uniform(k3, (input_channel, 2), jnp.float32,
                            minval=-bound2, maxval=bound2)
    b2 = jax.random.uniform(k4, (2,), jnp.float32,
                            minval=-bound2, maxval=bound2)
    return w1, b1, w2, b2


def ref_forward(x, w1, b1, w2, b2):
    """Pure-JAX reference (eval-mode dropout = identity)."""
    x2d = x.reshape(x.shape[0], -1)
    h = jnp.maximum(x2d @ w1 + b1.reshape(1, -1), 0.0)
    logits = h @ w2 + b2.reshape(1, -1)
    return jax.nn.softmax(logits, axis=1)


if __name__ == "__main__":
    C = 4  # input_channel

    key = jax.random.PRNGKey(0)
    kx, kp, kx2 = jax.random.split(key, 3)
    w1, b1, w2, b2 = init_params(C, kp)

    # Small primary case (single full-extent tile).
    B = 2
    x = jax.random.normal(kx, (B, C, 768), jnp.float32)
    out = jax.block_until_ready(cnnnet_forward(x, w1, b1, w2, b2))
    ref = ref_forward(x, w1, b1, w2, b2)
    assert out.shape == (B, 2)
    assert jnp.allclose(jnp.sum(out, axis=1), 1.0, atol=1e-4)
    # Tolerance accounts for bf16 MXU inputs (f32 accumulation) vs the pure-f32 reference.
    assert jnp.allclose(out, ref, atol=5e-3, rtol=5e-3)

    # Multi-tile case: two balanced 16-row tiles, padded tail rows exercised.
    B2 = 20
    x2 = jax.random.normal(kx2, (B2, C, 768), jnp.float32)
    out2 = jax.block_until_ready(cnnnet_forward(x2, w1, b1, w2, b2))
    ref2 = ref_forward(x2, w1, b1, w2, b2)
    assert out2.shape == (B2, 2)
    assert jnp.allclose(jnp.sum(out2, axis=1), 1.0, atol=1e-4)
    assert jnp.allclose(out2, ref2, atol=5e-3, rtol=5e-3)

    print("KERNEL_OK")
</pallas_src>

<mosaic_0001>
module attributes {stable_mosaic.version = 11 : i64} {
  func.func @cnnnet_kernel(%arg0: i32, %arg1: memref<2x3072xf32, #tpu.memory_space<vmem>>, %arg2: memref<3072x4xf32, #tpu.memory_space<vmem>>, %arg3: memref<1x4xf32, #tpu.memory_space<vmem>>, %arg4: memref<4x2xf32, #tpu.memory_space<vmem>>, %arg5: memref<1x2xf32, #tpu.memory_space<vmem>>, %arg6: memref<2x2xf32, #tpu.memory_space<vmem>>) attributes {dimension_semantics = [#tpu.dimension_semantics<parallel>], iteration_bounds = array<i64: 1>, scalar_prefetch = 0 : i64, scratch_operands = 0 : i64, tpu.core_type = #tpu.core_type<tc>, window_params = [{transform_indices = @transform_0, window_bounds = array<i64: 2, 3072>}, {pipeline_mode = #tpu.pipeline_mode<synchronous>, transform_indices = @transform_1, window_bounds = array<i64: 3072, 4>}, {pipeline_mode = #tpu.pipeline_mode<synchronous>, transform_indices = @transform_2, window_bounds = array<i64: 1, 4>}, {pipeline_mode = #tpu.pipeline_mode<synchronous>, transform_indices = @transform_3, window_bounds = array<i64: 4, 2>}, {pipeline_mode = #tpu.pipeline_mode<synchronous>, transform_indices = @transform_4, window_bounds = array<i64: 1, 2>}, {transform_indices = @transform_5, window_bounds = array<i64: 2, 2>}]} {
    %c0 = arith.constant 0 : index
    %c0_0 = arith.constant 0 : index
    %0 = vector.load %arg1[%c0, %c0_0] : memref<2x3072xf32, #tpu.memory_space<vmem>>, vector<2x3072xf32>
    %1 = arith.truncf %0 : vector<2x3072xf32> to vector<2x3072xbf16>
    %c0_1 = arith.constant 0 : index
    %c0_2 = arith.constant 0 : index
    %2 = vector.load %arg2[%c0_1, %c0_2] : memref<3072x4xf32, #tpu.memory_space<vmem>>, vector<3072x4xf32>
    %3 = arith.truncf %2 : vector<3072x4xf32> to vector<3072x4xbf16>
    %cst = arith.constant dense<0.000000e+00> : vector<2x4xf32>
    %4 = tpu.matmul %1, %3, %cst {dimension_numbers = #tpu.dot_dimension_numbers<[1], [0], [0], [1], [0, 0, 1, 1], [], []>} : vector<2x3072xbf16>, vector<3072x4xbf16>, vector<2x4xf32> -> vector<2x4xf32>
    %c0_3 = arith.constant 0 : index
    %c0_4 = arith.constant 0 : index
    %5 = vector.load %arg3[%c0_3, %c0_4] : memref<1x4xf32, #tpu.memory_space<vmem>>, vector<1x4xf32>
    %6 = vector.broadcast %5 : vector<1x4xf32> to vector<2x4xf32>
    %7 = arith.addf %4, %6 : vector<2x4xf32>
    %cst_5 = arith.constant 0.000000e+00 : f32
    %8 = vector.broadcast %cst_5 : f32 to vector<2x4xf32>
    %9 = arith.maximumf %7, %8 : vector<2x4xf32>
    %c0_6 = arith.constant 0 : index
    %c1 = arith.constant 1 : index
    %10 = vector.load %arg4[%c0_6, %c1] : memref<4x2xf32, #tpu.memory_space<vmem>>, vector<4x1xf32>
    %c0_7 = arith.constant 0 : index
    %c0_8 = arith.constant 0 : index
    %11 = vector.load %arg4[%c0_7, %c0_8] : memref<4x2xf32, #tpu.memory_space<vmem>>, vector<4x1xf32>
    %12 = arith.subf %10, %11 : vector<4x1xf32>
    %c0_9 = arith.constant 0 : index
    %c1_10 = arith.constant 1 : index
    %13 = vector.load %arg5[%c0_9, %c1_10] : memref<1x2xf32, #tpu.memory_space<vmem>>, vector<1x1xf32>
    %c0_11 = arith.constant 0 : index
    %c0_12 = arith.constant 0 : index
    %14 = vector.load %arg5[%c0_11, %c0_12] : memref<1x2xf32, #tpu.memory_space<vmem>>, vector<1x1xf32>
    %15 = arith.subf %13, %14 : vector<1x1xf32>
    %cst_13 = arith.constant dense<0.000000e+00> : vector<2x1xf32>
    %16 = tpu.matmul %9, %12, %cst_13 {dimension_numbers = #tpu.dot_dimension_numbers<[1], [0], [0], [1], [0, 0, 1, 1], [], []>} : vector<2x4xf32>, vector<4x1xf32>, vector<2x1xf32> -> vector<2x1xf32>
    %17 = vector.broadcast %15 : vector<1x1xf32> to vector<2x1xf32>
    %18 = arith.addf %16, %17 : vector<2x1xf32>
    %19 = math.absf %18 : vector<2x1xf32>
    %cst_14 = arith.constant 0.000000e+00 : f32
    %20 = vector.broadcast %cst_14 : f32 to vector<2x1xf32>
    %21 = arith.subf %20, %19 : vector<2x1xf32>
    %22 = math.exp %21 : vector<2x1xf32>
    %cst_15 = arith.constant 1.000000e+00 : f32
    %23 = vector.broadcast %cst_15 : f32 to vector<2x1xf32>
    %24 = arith.addf %23, %22 : vector<2x1xf32>
    %cst_16 = arith.constant 1.000000e+00 : f32
    %25 = vector.broadcast %cst_16 : f32 to vector<2x1xf32>
    %26 = arith.divf %25, %24 : vector<2x1xf32>
    %27 = arith.mulf %22, %26 : vector<2x1xf32>
    %cst_17 = arith.constant 0.000000e+00 : f32
    %28 = vector.broadcast %cst_17 : f32 to vector<2x1xf32>
    %29 = arith.cmpf oge, %18, %28 : vector<2x1xf32>
    %30 = arith.select %29, %27, %26 : vector<2x1xi1>, vector<2x1xf32>
    %31 = arith.select %29, %26, %27 : vector<2x1xi1>, vector<2x1xf32>
    %32 = tpu.iota {dimensions = array<i32: 1>} : vector<2x2xi32>
    %c0_i32 = arith.constant 0 : i32
    %33 = vector.broadcast %c0_i32 : i32 to vector<2x2xi32>
    %34 = arith.cmpi eq, %32, %33 : vector<2x2xi32>
    %35 = vector.shape_cast %30 : vector<2x1xf32> to vector<2x1xf32>
    %36 = vector.broadcast %35 : vector<2x1xf32> to vector<2x2xf32>
    %37 = vector.shape_cast %31 : vector<2x1xf32> to vector<2x1xf32>
    %38 = vector.broadcast %37 : vector<2x1xf32> to vector<2x2xf32>
    %39 = arith.select %34, %36, %38 : vector<2x2xi1>, vector<2x2xf32>
    %c0_18 = arith.constant 0 : index
    %c0_19 = arith.constant 0 : index
    %40 = vector.load %arg6[%c0_18, %c0_19] : memref<2x2xf32, #tpu.memory_space<vmem>>, vector<2x2xf32>
    tpu.vector_store %arg6[%c0_18, %c0_19], %39 {strides = array<i32>} : memref<2x2xf32, #tpu.memory_space<vmem>>, vector<2x2xf32>,
    return
  }
  func.func @transform_0(%arg0: i32) -> (i32, i32) {
    %c0_i32 = arith.constant 0 : i32
    %c0_i32_0 = arith.constant 0 : i32
    return %arg0, %c0_i32 : i32, i32
  }
  func.func @transform_1(%arg0: i32) -> (i32, i32) {
    %c0_i32 = arith.constant 0 : i32
    %c0_i32_0 = arith.constant 0 : i32
    %c0_i32_1 = arith.constant 0 : i32
    return %c0_i32, %c0_i32_0 : i32, i32
  }
  func.func @transform_2(%arg0: i32) -> (i32, i32) {
    %c0_i32 = arith.constant 0 : i32
    %c0_i32_0 = arith.constant 0 : i32
    %c0_i32_1 = arith.constant 0 : i32
    return %c0_i32, %c0_i32_0 : i32, i32
  }
  func.func @transform_3(%arg0: i32) -> (i32, i32) {
    %c0_i32 = arith.constant 0 : i32
    %c0_i32_0 = arith.constant 0 : i32
    %c0_i32_1 = arith.constant 0 : i32
    return %c0_i32, %c0_i32_0 : i32, i32
  }
  func.func @transform_4(%arg0: i32) -> (i32, i32) {
    %c0_i32 = arith.constant 0 : i32
    %c0_i32_0 = arith.constant 0 : i32
    %c0_i32_1 = arith.constant 0 : i32
    return %c0_i32, %c0_i32_0 : i32, i32
  }
  func.func @transform_5(%arg0: i32) -> (i32, i32) {
    %c0_i32 = arith.constant 0 : i32
    %c0_i32_0 = arith.constant 0 : i32
    return %arg0, %c0_i32 : i32, i32
  }
}

</mosaic_0001>

<bundles_post_ra>
// kernel: tpu_custom_call.1
= control target key start
LH: loop header
LB: loop body
LE: loop exit
PB: predicated region body
PF: predicated region fallthrough
CT: control target
= control target key end

     0   :  { %s1148_s18 = smov 1   ;;  %s2407_s0 = inlined_call_operand.vmem [shape: f32[2,3072], index: 0, kind: input, shape index: {}]   ;;  %s2408_s1 = inlined_call_operand.vmem [shape: f32[3072,4], index: 1, kind: input, shape index: {}]   ;;  %s2409_s2 = inlined_call_operand.vmem [shape: f32[1,4], index: 2, kind: input, shape index: {}]   ;;  %s2410_s3 = inlined_call_operand.vmem [shape: f32[4,2], index: 3, kind: input, shape index: {}]   ;;  %s2411_s4 = inlined_call_operand.vmem [shape: f32[1,2], index: 4, kind: input, shape index: {}]   ;;  %s2412_s5 = inlined_call_operand.hbm [shape: f32[2,2], index: 5, kind: output, shape index: {}]  }
   0x1   :  { %v126_v0 = vld [vmem:[%s2408_s1 + $0x70] sm:$0xff]  ;;  %v127_v1 = vld [vmem:[%s2408_s1 + $0x78] sm:$0xff]  ;;  %v124_v11 = vld [vmem:[%s2408_s1 + $0x60] sm:$0xff] }
   0x2   :  { %v142_v2 = vld [vmem:[%s2408_s1 + $0xf0] sm:$0xff]  ;;  %v503_v3 = vpack.c.bf16 %v127_v1, %v126_v0  ;;  %v143_v4 = vld [vmem:[%s2408_s1 + $0xf8] sm:$0xff]  ;;  %v125_v13 = vld [vmem:[%s2408_s1 + $0x68] sm:$0xff] }
   0x3   :  { %v158_v5 = vld [vmem:[%s2408_s1 + $0x170] sm:$0xff]  ;;  %v159_v6 = vld [vmem:[%s2408_s1 + $0x178] sm:$0xff]  ;;  %v511_v7 = vpack.c.bf16 %v143_v4, %v142_v2  ;;  %v140_v14 = vld [vmem:[%s2408_s1 + $0xe0] sm:$0xff]  ;;  %v502_v16 = vpack.c.bf16 %v125_v13, %v124_v11 }
   0x4   :  { %v519_v8 = vpack.c.bf16 %v159_v6, %v158_v5  ;;  %v174_v9 = vld [vmem:[%s2408_s1 + $0x1f0] sm:$0xff]  ;;  %v175_v10 = vld [vmem:[%s2408_s1 + $0x1f8] sm:$0xff]  ;;  %692 = vmatpush.bf16.msra.mxu0 %v503_v3  ;;  %v141_v15 = vld [vmem:[%s2408_s1 + $0xe8] sm:$0xff] }
   0x5   :  { %v527_v12 = vpack.c.bf16 %v175_v10, %v174_v9  ;;  %705 = vmatpush.bf16.msra.mxu1 %v511_v7  ;;  %v510_v17 = vpack.c.bf16 %v141_v15, %v140_v14  ;;  %v156_v18 = vld [vmem:[%s2408_s1 + $0x160] sm:$0xff]  ;;  %v157_v19 = vld [vmem:[%s2408_s1 + $0x168] sm:$0xff]  ;;  %v122_v23 = vld [vmem:[%s2408_s1 + $0x50] sm:$0xff] }
   0x6   :  { %718 = vmatpush.bf16.msra.mxu2 %v519_v8  ;;  %v172_v20 = vld [vmem:[%s2408_s1 + $0x1e0] sm:$0xff]  ;;  %v518_v21 = vpack.c.bf16 %v157_v19, %v156_v18  ;;  %v173_v22 = vld [vmem:[%s2408_s1 + $0x1e8] sm:$0xff]  ;;  %v123_v24 = vld [vmem:[%s2408_s1 + $0x58] sm:$0xff] }
   0x7   :  { %731 = vmatpush.bf16.msra.mxu3 %v527_v12  ;;  %v526_v25 = vpack.c.bf16 %v173_v22, %v172_v20  ;;  %v138_v26 = vld [vmem:[%s2408_s1 + $0xd0] sm:$0xff]  ;;  %v139_v27 = vld [vmem:[%s2408_s1 + $0xd8] sm:$0xff]  ;;  %v501_v29 = vpack.c.bf16 %v123_v24, %v122_v23  ;;  %v120_v35 = vld [vmem:[%s2408_s1 + $0x40] sm:$0xff] }
   0x8   :  { %v154_v28 = vld [vmem:[%s2408_s1 + $0x150] sm:$0xff]  ;;  %693 = vmatpush.bf16.msra.mxu0 %v502_v16  ;;  %v155_v30 = vld [vmem:[%s2408_s1 + $0x158] sm:$0xff]  ;;  %v509_v33 = vpack.c.bf16 %v139_v27, %v138_v26  ;;  %v121_v36 = vld [vmem:[%s2408_s1 + $0x48] sm:$0xff] }
   0x9   :  { %v170_v31 = vld [vmem:[%s2408_s1 + $0x1d0] sm:$0xff]  ;;  %v171_v32 = vld [vmem:[%s2408_s1 + $0x1d8] sm:$0xff]  ;;  %706 = vmatpush.bf16.msra.mxu1 %v510_v17  ;;  %v517_v34 = vpack.c.bf16 %v155_v30, %v154_v28  ;;  %v136_v37 = vld [vmem:[%s2408_s1 + $0xc0] sm:$0xff]  ;;  %v500_v44 = vpack.c.bf16 %v121_v36, %v120_v35 }
   0xa   :  { %719 = vmatpush.bf16.msra.mxu2 %v518_v21  ;;  %v525_v38 = vpack.c.bf16 %v171_v32, %v170_v31  ;;  %v137_v39 = vld [vmem:[%s2408_s1 + $0xc8] sm:$0xff]  ;;  %v152_v40 = vld [vmem:[%s2408_s1 + $0x140] sm:$0xff]  ;;  %v118_v47 = vld [vmem:[%s2408_s1 + $0x30] sm:$0xff] }
   0xb   :  { %732 = vmatpush.bf16.msra.mxu3 %v526_v25  ;;  %v153_v41 = vld [vmem:[%s2408_s1 + $0x148] sm:$0xff]  ;;  %v168_v42 = vld [vmem:[%s2408_s1 + $0x1c0] sm:$0xff]  ;;  %v508_v45 = vpack.c.bf16 %v137_v39, %v136_v37  ;;  %v119_v48 = vld [vmem:[%s2408_s1 + $0x38] sm:$0xff] }
   0xc   :  { %v169_v43 = vld [vmem:[%s2408_s1 + $0x1c8] sm:$0xff]  ;;  %694 = vmatpush.bf16.msra.mxu0 %v501_v29  ;;  %v516_v46 = vpack.c.bf16 %v153_v41, %v152_v40  ;;  %v134_v49 = vld [vmem:[%s2408_s1 + $0xb0] sm:$0xff]  ;;  %v135_v51 = vld [vmem:[%s2408_s1 + $0xb8] sm:$0xff]  ;;  %v499_v56 = vpack.c.bf16 %v119_v48, %v118_v47 }
   0xd   :  { %707 = vmatpush.bf16.msra.mxu1 %v509_v33  ;;  %v524_v50 = vpack.c.bf16 %v169_v43, %v168_v42  ;;  %v150_v52 = vld [vmem:[%s2408_s1 + $0x130] sm:$0xff]  ;;  %v151_v53 = vld [vmem:[%s2408_s1 + $0x138] sm:$0xff]  ;;  %v507_v57 = vpack.c.bf16 %v135_v51, %v134_v49  ;;  %v116_v59 = vld [vmem:[%s2408_s1 + $0x20] sm:$0xff] }
   0xe   :  { %720 = vmatpush.bf16.msra.mxu2 %v517_v34  ;;  %v166_v54 = vld [vmem:[%s2408_s1 + $0x1b0] sm:$0xff]  ;;  %v167_v55 = vld [vmem:[%s2408_s1 + $0x1b8] sm:$0xff]  ;;  %v515_v58 = vpack.c.bf16 %v151_v53, %v150_v52  ;;  %v117_v60 = vld [vmem:[%s2408_s1 + $0x28] sm:$0xff] }
   0xf   :  { %733 = vmatpush.bf16.msra.mxu3 %v525_v38  ;;  %v132_v61 = vld [vmem:[%s2408_s1 + $0xa0] sm:$0xff]  ;;  %v523_v62 = vpack.c.bf16 %v167_v55, %v166_v54  ;;  %v133_v63 = vld [vmem:[%s2408_s1 + $0xa8] sm:$0xff]  ;;  %v498_v4 = vpack.c.bf16 %v117_v60, %v116_v59  ;;  %v114_v7 = vld [vmem:[%s2408_s1 + $0x10] sm:$0xff] }
  0x10   :  { %695 = vmatpush.bf16.msra.mxu0 %v500_v44  ;;  %v148_v0 = vld [vmem:[%s2408_s1 + $0x120] sm:$0xff]  ;;  %v149_v1 = vld [vmem:[%s2408_s1 + $0x128] sm:$0xff]  ;;  %v506_v5 = vpack.c.bf16 %v133_v63, %v132_v61  ;;  %v115_v8 = vld [vmem:[%s2408_s1 + $0x18] sm:$0xff] }
  0x11   :  { %708 = vmatpush.bf16.msra.mxu1 %v508_v45  ;;  %v164_v2 = vld [vmem:[%s2408_s1 + $0x1a0] sm:$0xff]  ;;  %v165_v3 = vld [vmem:[%s2408_s1 + $0x1a8] sm:$0xff]  ;;  %v514_v6 = vpack.c.bf16 %v149_v1, %v148_v0  ;;  %v130_v9 = vld [vmem:[%s2408_s1 + $0x90] sm:$0xff]  ;;  %v497_v16 = vpack.c.bf16 %v115_v8, %v114_v7 }
  0x12   :  { %721 = vmatpush.bf16.msra.mxu2 %v516_v46  ;;  %v522_v10 = vpack.c.bf16 %v165_v3, %v164_v2  ;;  %v131_v11 = vld [vmem:[%s2408_s1 + $0x98] sm:$0xff]  ;;  %v146_v12 = vld [vmem:[%s2408_s1 + $0x110] sm:$0xff]  ;;  %v112_v17 = vld [vmem:[%s2408_s1] sm:$0xff] }
  0x13   :  { %734 = vmatpush.bf16.msra.mxu3 %v524_v50  ;;  %v147_v13 = vld [vmem:[%s2408_s1 + $0x118] sm:$0xff]  ;;  %v162_v14 = vld [vmem:[%s2408_s1 + $0x190] sm:$0xff]  ;;  %v113_v18 = vld [vmem:[%s2408_s1 + $0x8] sm:$0xff]  ;;  %v505_v19 = vpack.c.bf16 %v131_v11, %v130_v9 }
  0x14   :  { %696 = vmatpush.bf16.msra.mxu0 %v499_v56  ;;  %v163_v15 = vld [vmem:[%s2408_s1 + $0x198] sm:$0xff]  ;;  %v513_v20 = vpack.c.bf16 %v147_v13, %v146_v12  ;;  %v128_v21 = vld [vmem:[%s2408_s1 + $0x80] sm:$0xff]  ;;  %v129_v22 = vld [vmem:[%s2408_s1 + $0x88] sm:$0xff]  ;;  %v496_v31 = vpack.c.bf16 %v113_v18, %v112_v17 }
  0x15   :  { %709 = vmatpush.bf16.msra.mxu1 %v507_v57  ;;  %v144_v23 = vld [vmem:[%s2408_s1 + $0x100] sm:$0xff]  ;;  %v521_v24 = vpack.c.bf16 %v163_v15, %v162_v14  ;;  %v145_v25 = vld [vmem:[%s2408_s1 + $0x108] sm:$0xff]  ;;  %v190_v28 = vld [vmem:[%s2408_s1 + $0x270] sm:$0xff]  ;;  %v504_v35 = vpack.c.bf16 %v129_v22, %v128_v21 }
  0x16   :  { %722 = vmatpush.bf16.msra.mxu2 %v515_v58  ;;  %v160_v26 = vld [vmem:[%s2408_s1 + $0x180] sm:$0xff]  ;;  %v161_v27 = vld [vmem:[%s2408_s1 + $0x188] sm:$0xff]  ;;  %v191_v29 = vld [vmem:[%s2408_s1 + $0x278] sm:$0xff]  ;;  %v512_v36 = vpack.c.bf16 %v145_v25, %v144_v23 }
  0x17   :  { %735 = vmatpush.bf16.msra.mxu3 %v523_v62  ;;  %v206_v30 = vld [vmem:[%s2408_s1 + $0x2f0] sm:$0xff]  ;;  %v207_v32 = vld [vmem:[%s2408_s1 + $0x2f8] sm:$0xff]  ;;  %v520_v39 = vpack.c.bf16 %v161_v27, %v160_v26  ;;  %v535_v40 = vpack.c.bf16 %v191_v29, %v190_v28  ;;  %v188_v43 = vld [vmem:[%s2408_s1 + $0x260] sm:$0xff] }
  0x18   :  { %697 = vmatpush.bf16.msra.mxu0 %v498_v4  ;;  %v222_v33 = vld [vmem:[%s2408_s1 + $0x370] sm:$0xff]  ;;  %v223_v34 = vld [vmem:[%s2408_s1 + $0x378] sm:$0xff]  ;;  %v543_v41 = vpack.c.bf16 %v207_v32, %v206_v30  ;;  %v189_v44 = vld [vmem:[%s2408_s1 + $0x268] sm:$0xff] }
  0x19   :  { %710 = vmatpush.bf16.msra.mxu1 %v506_v5  ;;  %v238_v37 = vld [vmem:[%s2408_s1 + $0x3f0] sm:$0xff]  ;;  %v239_v38 = vld [vmem:[%s2408_s1 + $0x3f8] sm:$0xff]  ;;  %v551_v42 = vpack.c.bf16 %v223_v34, %v222_v33  ;;  %v204_v45 = vld [vmem:[%s2408_s1 + $0x2e0] sm:$0xff]  ;;  %v534_v52 = vpack.c.bf16 %v189_v44, %v188_v43 }
  0x1a   :  { %723 = vmatpush.bf16.msra.mxu2 %v514_v6  ;;  %v559_v46 = vpack.c.bf16 %v239_v38, %v238_v37  ;;  %v205_v47 = vld [vmem:[%s2408_s1 + $0x2e8] sm:$0xff]  ;;  %v220_v48 = vld [vmem:[%s2408_s1 + $0x360] sm:$0xff]  ;;  %v186_v55 = vld [vmem:[%s2408_s1 + $0x250] sm:$0xff] }
  0x1b   :  { %736 = vmatpush.bf16.msra.mxu3 %v522_v10  ;;  %v221_v49 = vld [vmem:[%s2408_s1 + $0x368] sm:$0xff]  ;;  %v236_v50 = vld [vmem:[%s2408_s1 + $0x3e0] sm:$0xff]  ;;  %v542_v53 = vpack.c.bf16 %v205_v47, %v204_v45  ;;  %v187_v56 = vld [vmem:[%s2408_s1 + $0x258] sm:$0xff] }
  0x1c   :  { %698 = vmatpush.bf16.msra.mxu0 %v497_v16  ;;  %v237_v51 = vld [vmem:[%s2408_s1 + $0x3e8] sm:$0xff]  ;;  %v550_v54 = vpack.c.bf16 %v221_v49, %v220_v48  ;;  %v202_v57 = vld [vmem:[%s2408_s1 + $0x2d0] sm:$0xff]  ;;  %v203_v59 = vld [vmem:[%s2408_s1 + $0x2d8] sm:$0xff]  ;;  %v533_v0 = vpack.c.bf16 %v187_v56, %v186_v55 }
  0x1d   :  { %711 = vmatpush.bf16.msra.mxu1 %v505_v19  ;;  %v558_v58 = vpack.c.bf16 %v237_v51, %v236_v50  ;;  %v218_v60 = vld [vmem:[%s2408_s1 + $0x350] sm:$0xff]  ;;  %v219_v61 = vld [vmem:[%s2408_s1 + $0x358] sm:$0xff]  ;;  %v21_v1 = vld [vmem:[%s2407_s0] sm:$0xff]  ;;  %v541_v2 = vpack.c.bf16 %v203_v59, %v202_v57 }
  0x1e   :  { %724 = vmatpush.bf16.msra.mxu2 %v513_v20  ;;  %v234_v62 = vld [vmem:[%s2408_s1 + $0x3d0] sm:$0xff]  ;;  %v235_v63 = vld [vmem:[%s2408_s1 + $0x3d8] sm:$0xff]  ;;  %v549_v3 = vpack.c.bf16 %v219_v61, %v218_v60  ;;  %v184_v4 = vld [vmem:[%s2408_s1 + $0x240] sm:$0xff]  ;;  %33 = vst [vmem:[#allocation1] ss:$4 sm:$0xff] %v21_v1 }
  0x1f   :  { %737 = vmatpush.bf16.msra.mxu3 %v521_v24  ;;  %v185_v5 = vld [vmem:[%s2408_s1 + $0x248] sm:$0xff]  ;;  %v200_v6 = vld [vmem:[%s2408_s1 + $0x2c0] sm:$0xff]  ;;  %v557_v7 = vpack.c.bf16 %v235_v63, %v234_v62  ;;  %v182_v14 = vld [vmem:[%s2408_s1 + $0x230] sm:$0xff] }
  0x20   :  { %699 = vmatpush.bf16.msra.mxu0 %v496_v31  ;;  %v201_v8 = vld [vmem:[%s2408_s1 + $0x2c8] sm:$0xff]  ;;  %v216_v9 = vld [vmem:[%s2408_s1 + $0x340] sm:$0xff]  ;;  %v532_v13 = vpack.c.bf16 %v185_v5, %v184_v4  ;;  %v183_v15 = vld [vmem:[%s2408_s1 + $0x238] sm:$0xff] }
  0x21   :  { %712 = vmatpush.bf16.msra.mxu1 %v504_v35  ;;  %v217_v10 = vld [vmem:[%s2408_s1 + $0x348] sm:$0xff]  ;;  %v232_v11 = vld [vmem:[%s2408_s1 + $0x3c0] sm:$0xff]  ;;  %v540_v16 = vpack.c.bf16 %v201_v8, %v200_v6  ;;  %v198_v18 = vld [vmem:[%s2408_s1 + $0x2b0] sm:$0xff]  ;;  %v531_v28 = vpack.c.bf16 %v183_v15, %v182_v14 }
  0x22   :  { %725 = vmatpush.bf16.msra.mxu2 %v512_v36  ;;  %v233_v12 = vld [vmem:[%s2408_s1 + $0x3c8] sm:$0xff]  ;;  %v548_v17 = vpack.c.bf16 %v217_v10, %v216_v9  ;;  %v199_v19 = vld [vmem:[%s2408_s1 + $0x2b8] sm:$0xff]  ;;  %v214_v20 = vld [vmem:[%s2408_s1 + $0x330] sm:$0xff] }
  0x23   :  { %738 = vmatpush.bf16.msra.mxu3 %v520_v39  ;;  %v556_v21 = vpack.c.bf16 %v233_v12, %v232_v11  ;;  %v215_v22 = vld [vmem:[%s2408_s1 + $0x338] sm:$0xff]  ;;  %v230_v23 = vld [vmem:[%s2408_s1 + $0x3b0] sm:$0xff]  ;;  %v180_v25 = vld [vmem:[%s2408_s1 + $0x220] sm:$0xff]  ;;  %v539_v29 = vpack.c.bf16 %v199_v19, %v198_v18 }
  0x24   :  { %744 = vmatpush.bf16.msrb.mxu0 %v535_v40  ;;  %v231_v24 = vld [vmem:[%s2408_s1 + $0x3b8] sm:$0xff]  ;;  %v181_v26 = vld [vmem:[%s2408_s1 + $0x228] sm:$0xff]  ;;  %v23_v27 = vld [vmem:[%s2407_s0 + $0x10] sm:$0xff]  ;;  %v547_v33 = vpack.c.bf16 %v215_v22, %v214_v20 }
  0x25   :  { %757 = vmatpush.bf16.msrb.mxu1 %v543_v41  ;;  %v196_v30 = vld [vmem:[%s2408_s1 + $0x2a0] sm:$0xff]  ;;  %v38_v31 = vld.sshfl [vmem:[#allocation1 + $0x10] sm:$0xff pattern:$0x73625140]  ;;  %v555_v38 = vpack.c.bf16 %v231_v24, %v230_v23  ;;  %v197_v39 = vld [vmem:[%s2408_s1 + $0x2a8] sm:$0xff] }
  0x26   :  { %770 = vmatpush.bf16.msrb.mxu2 %v551_v42  ;;  %v36_v32 = vld.sshfl [vmem:[#allocation1] sm:$0xff pattern:$0x73625140]  ;;  %v90_v34 = vpack.c.bf16 %v38_v31, %v38_v31  ;;  %v39_v36 = vld.sshfl [vmem:[#allocation1 + $0x18] sm:$0xff pattern:$0x73625140]  ;;  %v538_v49 = vpack.c.bf16 %v197_v39, %v196_v30 }
  0x27   :  { %783 = vmatpush.bf16.msrb.mxu3 %v559_v46  ;;  %v88_v35 = vpack.c.bf16 %v36_v32, %v36_v32  ;;  %v37_v37 = vld.sshfl [vmem:[#allocation1 + $0x8] sm:$0xff pattern:$0x73625140]  ;;  %v212_v40 = vld [vmem:[%s2408_s1 + $0x320] sm:$0xff]  ;;  %v91_v42 = vpack.c.bf16 %v39_v36, %v39_v36  ;;  %v530_v46 = vpack.c.bf16 %v181_v26, %v180_v25  ;;  %v178_v47 = vld [vmem:[%s2408_s1 + $0x210] sm:$0xff] }
  0x28   :  { %745 = vmatpush.bf16.msrb.mxu0 %v534_v52  ;;  %v213_v41 = vld [vmem:[%s2408_s1 + $0x328] sm:$0xff]  ;;  %44 = vst [vmem:[#allocation1] ss:$4 sm:$0xff] %v23_v27  ;;  %v89_v43 = vpack.c.bf16 %v37_v37, %v37_v37  ;;  %v228_v44 = vld [vmem:[%s2408_s1 + $0x3a0] sm:$0xff]  ;;  %726 = vmatmul.bf16.vlgmr.msra.gmra.mxu2 %v90_v34  ;;  %v179_v48 = vld [vmem:[%s2408_s1 + $0x218] sm:$0xff] }
  0x29   :  { %758 = vmatpush.bf16.msrb.mxu1 %v542_v53  ;;  %v229_v45 = vld [vmem:[%s2408_s1 + $0x3a8] sm:$0xff]  ;;  %700 = vmatmul.bf16.vlgmr.msra.gmra.mxu0 %v88_v35  ;;  %v546_v50 = vpack.c.bf16 %v213_v41, %v212_v40  ;;  %v194_v51 = vld [vmem:[%s2408_s1 + $0x290] sm:$0xff]  ;;  %v195_v52 = vld [vmem:[%s2408_s1 + $0x298] sm:$0xff]  ;;  %v529_v61 = vpack.c.bf16 %v179_v48, %v178_v47 }
  0x2a   :  { %771 = vmatpush.bf16.msrb.mxu2 %v550_v54  ;;  %739 = vmatmul.bf16.vlgmr.msra.gmra.mxu3 %v91_v42  ;;  %v1005_v53 = vld [vmem:[%s2410_s3] sm:$0xf]  ;;  %v554_v54 = vpack.c.bf16 %v229_v45, %v228_v44  ;;  %v210_v55 = vld [vmem:[%s2408_s1 + $0x310] sm:$0xff]  ;;  %v211_v56 = vld [vmem:[%s2408_s1 + $0x318] sm:$0xff]  ;;  %v537_v1 = vpack.c.bf16 %v195_v52, %v194_v51 }
  0x2b   :  { %784 = vmatpush.bf16.msrb.mxu3 %v558_v58  ;;  %713 = vmatmul.bf16.vlgmr.msra.gmra.mxu1 %v89_v43  ;;  %v22_v57 = vld [vmem:[%s2407_s0 + $0x8] sm:$0xff]  ;;  %v226_v58 = vld [vmem:[%s2408_s1 + $0x390] sm:$0xff]  ;;  %v227_v59 = vld [vmem:[%s2408_s1 + $0x398] sm:$0xff] }
  0x2c   :  { %746 = vmatpush.bf16.msrb.mxu0 %v533_v0  ;;  %v176_v60 = vld [vmem:[%s2408_s1 + $0x200] sm:$0xff]  ;;  %1007 = vrot.lane.b32.xlu0 %v1005_v53, %s1148_s18  ;;  %35 = vst [vmem:[#allocation1 + $0x20] ss:$4 sm:$0xff] %v22_v57  ;;  %v177_v62 = vld [vmem:[%s2408_s1 + $0x208] sm:$0xff]  ;;  %v553_v6 = vpack.c.bf16 %v227_v59, %v226_v58  ;;  %v254_v8 = vld [vmem:[%s2408_s1 + $0x470] sm:$0xff] }
  0x2d   :  { %759 = vmatpush.bf16.msrb.mxu1 %v541_v2  ;;  %v192_v63 = vld [vmem:[%s2408_s1 + $0x280] sm:$0xff]  ;;  %v193_v0 = vld [vmem:[%s2408_s1 + $0x288] sm:$0xff]  ;;  %v545_v2 = vpack.c.bf16 %v211_v56, %v210_v55  ;;  %v255_v9 = vld [vmem:[%s2408_s1 + $0x478] sm:$0xff] }
  0x2e   :  { %772 = vmatpush.bf16.msrb.mxu2 %v549_v3  ;;  %v208_v3 = vld [vmem:[%s2408_s1 + $0x300] sm:$0xff]  ;;  %v209_v4 = vld [vmem:[%s2408_s1 + $0x308] sm:$0xff]  ;;  %v270_v10 = vld [vmem:[%s2408_s1 + $0x4f0] sm:$0xff]  ;;  %v567_v23 = vpack.c.bf16 %v255_v9, %v254_v8 }
  0x2f   :  { %785 = vmatpush.bf16.msrb.mxu3 %v557_v7  ;;  %v224_v5 = vld [vmem:[%s2408_s1 + $0x380] sm:$0xff]  ;;  %v225_v7 = vld [vmem:[%s2408_s1 + $0x388] sm:$0xff]  ;;  %v271_v11 = vld [vmem:[%s2408_s1 + $0x4f8] sm:$0xff]  ;;  %v544_v18 = vpack.c.bf16 %v209_v4, %v208_v3 }
  0x30   :  { %747 = vmatpush.bf16.msrb.mxu0 %v532_v13  ;;  %v286_v12 = vld [vmem:[%s2408_s1 + $0x570] sm:$0xff]  ;;  %v528_v13 = vpack.c.bf16 %v177_v62, %v176_v60  ;;  %v287_v14 = vld [vmem:[%s2408_s1 + $0x578] sm:$0xff]  ;;  %v252_v19 = vld [vmem:[%s2408_s1 + $0x460] sm:$0xff]  ;;  %v552_v22 = vpack.c.bf16 %v225_v7, %v224_v5  ;;  %v575_v27 = vpack.c.bf16 %v271_v11, %v270_v10 }
  0x31   :  { %760 = vmatpush.bf16.msrb.mxu1 %v540_v16  ;;  %v302_v15 = vld [vmem:[%s2408_s1 + $0x5f0] sm:$0xff]  ;;  %v303_v16 = vld [vmem:[%s2408_s1 + $0x5f8] sm:$0xff]  ;;  %v253_v20 = vld [vmem:[%s2408_s1 + $0x468] sm:$0xff] }
  0x32   :  { %773 = vmatpush.bf16.msrb.mxu2 %v548_v17  ;;  %v536_v17 = vpack.c.bf16 %v193_v0, %v192_v63  ;;  %v268_v24 = vld [vmem:[%s2408_s1 + $0x4e0] sm:$0xff]  ;;  %v591_v31 = vpack.c.bf16 %v303_v16, %v302_v15  ;;  %v269_v32 = vld [vmem:[%s2408_s1 + $0x4e8] sm:$0xff]  ;;  %v566_v40 = vpack.c.bf16 %v253_v20, %v252_v19  ;;  %v250_v44 = vld [vmem:[%s2408_s1 + $0x450] sm:$0xff] }
  0x33   :  { %786 = vmatpush.bf16.msrb.mxu3 %v556_v21  ;;  %v24_v21 = vld [vmem:[%s2407_s0 + $0x18] sm:$0xff]  ;;  %v42_v25 = vld.sshfl [vmem:[#allocation1 + $0x30] sm:$0xff pattern:$0x73625140]  ;;  %v285_v34 = vld [vmem:[%s2408_s1 + $0x568] sm:$0xff]  ;;  %v574_v42 = vpack.c.bf16 %v269_v32, %v268_v24 }
  0x34   :  { %748 = vmatpush.bf16.msrb.mxu0 %v531_v28  ;;  %v40_v26 = vld.sshfl [vmem:[#allocation1 + $0x20] sm:$0xff pattern:$0x73625140]  ;;  %v583_v28 = vpack.c.bf16 %v287_v14, %v286_v12  ;;  %v41_v30 = vld.sshfl [vmem:[#allocation1 + $0x28] sm:$0xff pattern:$0x73625140]  ;;  %v94_v35 = vpack.c.bf16 %v42_v25, %v42_v25 }
  0x35   :  { %761 = vmatpush.bf16.msrb.mxu1 %v539_v29  ;;  %v43_v29 = vld.sshfl [vmem:[#allocation1 + $0x38] sm:$0xff pattern:$0x73625140]  ;;  %v300_v36 = vld [vmem:[%s2408_s1 + $0x5e0] sm:$0xff]  ;;  %v301_v37 = vld [vmem:[%s2408_s1 + $0x5e8] sm:$0xff]  ;;  %v93_v41 = vpack.c.bf16 %v41_v30, %v41_v30 }
  0x36   :  { %774 = vmatpush.bf16.msrb.mxu2 %v547_v33  ;;  %v284_v33 = vld [vmem:[%s2408_s1 + $0x560] sm:$0xff]  ;;  %45 = vst [vmem:[#allocation1 + $0x20] ss:$4 sm:$0xff] %v24_v21  ;;  %v95_v39 = vpack.c.bf16 %v43_v29, %v43_v29  ;;  %v251_v45 = vld [vmem:[%s2408_s1 + $0x458] sm:$0xff]  ;;  %v590_v47 = vpack.c.bf16 %v301_v37, %v300_v36  ;;  %v298_v51 = vld [vmem:[%s2408_s1 + $0x5d0] sm:$0xff] }
  0x37   :  { %787 = vmatpush.bf16.msrb.mxu3 %v555_v38  ;;  %v92_v38 = vpack.c.bf16 %v40_v26, %v40_v26  ;;  %v582_v43 = vpack.c.bf16 %v285_v34, %v284_v33  ;;  %v267_v48 = vld [vmem:[%s2408_s1 + $0x4d8] sm:$0xff]  ;;  %v565_v53 = vpack.c.bf16 %v251_v45, %v250_v44  ;;  %v249_v57 = vld [vmem:[%s2408_s1 + $0x448] sm:$0xff]  ;;  %v264_v58 = vld [vmem:[%s2408_s1 + $0x4c0] sm:$0xff] }
  0x38   :  { %749 = vmatpush.bf16.msrb.mxu0 %v530_v46  ;;  %v266_v46 = vld [vmem:[%s2408_s1 + $0x4d0] sm:$0xff]  ;;  %v299_v52 = vld [vmem:[%s2408_s1 + $0x5d8] sm:$0xff]  ;;  %v265_v59 = vld [vmem:[%s2408_s1 + $0x4c8] sm:$0xff] }
  0x39   :  { %762 = vmatpush.bf16.msrb.mxu1 %v538_v49  ;;  %v282_v49 = vld [vmem:[%s2408_s1 + $0x550] sm:$0xff]  ;;  %v573_v55 = vpack.c.bf16 %v267_v48, %v266_v46  ;;  %v589_v60 = vpack.c.bf16 %v299_v52, %v298_v51  ;;  %v281_v62 = vld [vmem:[%s2408_s1 + $0x548] sm:$0xff]  ;;  %v296_v63 = vld [vmem:[%s2408_s1 + $0x5c0] sm:$0xff]  ;;  %v572_v8 = vpack.c.bf16 %v265_v59, %v264_v58 }
  0x3a   :  { %775 = vmatpush.bf16.msrb.mxu2 %v546_v50  ;;  %v283_v50 = vld [vmem:[%s2408_s1 + $0x558] sm:$0xff]  ;;  %v297_v0 = vld [vmem:[%s2408_s1 + $0x5c8] sm:$0xff]  ;;  %v262_v4 = vld [vmem:[%s2408_s1 + $0x4b0] sm:$0xff] }
  0x3b   :  { %788 = vmatpush.bf16.msrb.mxu3 %v554_v54  ;;  %v248_v54 = vld [vmem:[%s2408_s1 + $0x440] sm:$0xff]  ;;  %v581_v56 = vpack.c.bf16 %v283_v50, %v282_v49  ;;  %v263_v5 = vld [vmem:[%s2408_s1 + $0x4b8] sm:$0xff]  ;;  %v294_v10 = vld [vmem:[%s2408_s1 + $0x5b0] sm:$0xff] }
  0x3c   :  { %750 = vmatpush.bf16.msrb.mxu0 %v529_v61  ;;  %v280_v61 = vld [vmem:[%s2408_s1 + $0x540] sm:$0xff]  ;;  %v564_v3 = vpack.c.bf16 %v249_v57, %v248_v54  ;;  %v279_v7 = vld [vmem:[%s2408_s1 + $0x538] sm:$0xff]  ;;  %v1707_v15 = vld.sshfl [vmem:[#allocation1 + $0x10] sm:$0xff pattern:$0x73625140]  ;;  %v571_v19 = vpack.c.bf16 %v263_v5, %v262_v4 }
  0x3d   :  { %763 = vmatpush.bf16.msrb.mxu1 %v537_v1  ;;  %v246_v1 = vld [vmem:[%s2408_s1 + $0x430] sm:$0xff]  ;;  %v580_v9 = vpack.c.bf16 %v281_v62, %v280_v61  ;;  %v295_v11 = vld [vmem:[%s2408_s1 + $0x5b8] sm:$0xff]  ;;  %v25_v12 = vld [vmem:[%s2407_s0 + $0x20] sm:$0xff] }
  0x3e   :  { %776 = vmatpush.bf16.msrb.mxu2 %v545_v2  ;;  %v247_v2 = vld [vmem:[%s2408_s1 + $0x438] sm:$0xff]  ;;  %v1705_v14 = vld.sshfl [vmem:[#allocation1] sm:$0xff pattern:$0x73625140]  ;;  %v587_v24 = vpack.c.bf16 %v295_v11, %v294_v10  ;;  %v261_v25 = vld [vmem:[%s2408_s1 + $0x4a8] sm:$0xff] }
  0x3f   :  { %789 = vmatpush.bf16.msrb.mxu3 %v553_v6  ;;  %v278_v6 = vld [vmem:[%s2408_s1 + $0x530] sm:$0xff]  ;;  %v1709_v16 = vld.sshfl [vmem:[#allocation1 + $0x8] sm:$0xff pattern:$0x73625140]  ;;  %v244_v21 = vld [vmem:[%s2408_s1 + $0x420] sm:$0xff] }
  0x40   :  { %751 = vmatpush.bf16.msrb.mxu0 %v528_v13  ;;  %v588_v13 = vpack.c.bf16 %v297_v0, %v296_v63  ;;  %v579_v20 = vpack.c.bf16 %v279_v7, %v278_v6  ;;  %v276_v26 = vld [vmem:[%s2408_s1 + $0x520] sm:$0xff]  ;;  %v293_v29 = vld [vmem:[%s2408_s1 + $0x5a8] sm:$0xff]  ;;  %v242_v33 = vld [vmem:[%s2408_s1 + $0x410] sm:$0xff] }
  0x41   :  { %764 = vmatpush.bf16.msrb.mxu1 %v536_v17  ;;  %v1711_v17 = vld.sshfl [vmem:[#allocation1 + $0x18] sm:$0xff pattern:$0x73625140]  ;;  %v241_v44 = vld [vmem:[%s2408_s1 + $0x408] sm:$0xff]  ;;  %v272_v49 = vld [vmem:[%s2408_s1 + $0x500] sm:$0xff] }
  0x42   :  { %777 = vmatpush.bf16.msrb.mxu2 %v544_v18  ;;  %v563_v18 = vpack.c.bf16 %v247_v2, %v246_v1  ;;  %54 = vst [vmem:[#allocation1] ss:$4 sm:$0xff] %v25_v12  ;;  %v243_v34 = vld [vmem:[%s2408_s1 + $0x418] sm:$0xff]  ;;  %v257_v48 = vld [vmem:[%s2408_s1 + $0x488] sm:$0xff]  ;;  %v288_v52 = vld [vmem:[%s2408_s1 + $0x580] sm:$0xff] }
  0x43   :  { %790 = vmatpush.bf16.msrb.mxu3 %v552_v22  ;;  %752 = vmatmul.bf16.vlgmr.msrb.gmra.mxu0 %v92_v38  ;;  %v245_v22 = vld [vmem:[%s2408_s1 + $0x428] sm:$0xff]  ;;  %v259_v37 = vld [vmem:[%s2408_s1 + $0x498] sm:$0xff]  ;;  %v274_v38 = vld [vmem:[%s2408_s1 + $0x510] sm:$0xff] }
  0x44   :  { %796 = vmatpush.bf16.msra.mxu0 %v567_v23  ;;  %765 = vmatmul.bf16.vlgmr.msrb.gmra.mxu1 %v93_v41  ;;  %v260_v23 = vld [vmem:[%s2408_s1 + $0x4a0] sm:$0xff]  ;;  %v562_v30 = vpack.c.bf16 %v245_v22, %v244_v21  ;;  %v291_v41 = vld [vmem:[%s2408_s1 + $0x598] sm:$0xff]  ;;  %v273_v51 = vld [vmem:[%s2408_s1 + $0x508] sm:$0xff] }
  0x45   :  { %809 = vmatpush.bf16.msra.mxu1 %v575_v27  ;;  %778 = vmatmul.bf16.vlgmr.msrb.gmra.mxu2 %v94_v35  ;;  %v277_v27 = vld [vmem:[%s2408_s1 + $0x528] sm:$0xff]  ;;  %v258_v35 = vld [vmem:[%s2408_s1 + $0x490] sm:$0xff]  ;;  %v335_v58 = vld [vmem:[%s2408_s1 + $0x6f8] sm:$0xff]  ;;  %v576_v62 = vpack.c.bf16 %v273_v51, %v272_v49 }
  0x46   :  { %822 = vmatpush.bf16.msra.mxu2 %v583_v28  ;;  %791 = vmatmul.bf16.vlgmr.msrb.gmra.mxu3 %v95_v39  ;;  %v292_v28 = vld [vmem:[%s2408_s1 + $0x5a0] sm:$0xff]  ;;  %v578_v32 = vpack.c.bf16 %v277_v27, %v276_v26  ;;  %v275_v39 = vld [vmem:[%s2408_s1 + $0x518] sm:$0xff]  ;;  %v569_v45 = vpack.c.bf16 %v259_v37, %v258_v35  ;;  %v318_v54 = vld [vmem:[%s2408_s1 + $0x670] sm:$0xff] }
  0x47   :  { %835 = vmatpush.bf16.msra.mxu3 %v591_v31  ;;  %v570_v31 = vpack.c.bf16 %v261_v25, %v260_v23  ;;  %v586_v36 = vpack.c.bf16 %v293_v29, %v292_v28  ;;  %v577_v46 = vpack.c.bf16 %v275_v39, %v274_v38  ;;  %v350_v59 = vld [vmem:[%s2408_s1 + $0x770] sm:$0xff]  ;;  %v367_v0 = vld [vmem:[%s2408_s1 + $0x7f8] sm:$0xff]  ;;  %v316_v5 = vld [vmem:[%s2408_s1 + $0x660] sm:$0xff] }
  0x48   :  { %797 = vmatpush.bf16.msra.mxu0 %v566_v40  ;;  %v290_v40 = vld [vmem:[%s2408_s1 + $0x590] sm:$0xff]  ;;  %v317_v6 = vld [vmem:[%s2408_s1 + $0x668] sm:$0xff]  ;;  %v332_v7 = vld [vmem:[%s2408_s1 + $0x6e0] sm:$0xff] }
  0x49   :  { %810 = vmatpush.bf16.msra.mxu1 %v574_v42  ;;  %v561_v42 = vpack.c.bf16 %v243_v34, %v242_v33  ;;  %v585_v50 = vpack.c.bf16 %v291_v41, %v290_v40  ;;  %v366_v63 = vld [vmem:[%s2408_s1 + $0x7f0] sm:$0xff]  ;;  %v333_v10 = vld [vmem:[%s2408_s1 + $0x6e8] sm:$0xff]  ;;  %v348_v11 = vld [vmem:[%s2408_s1 + $0x760] sm:$0xff]  ;;  %v598_v21 = vpack.c.bf16 %v317_v6, %v316_v5 }
  0x4a   :  { %823 = vmatpush.bf16.msra.mxu2 %v582_v43  ;;  %v240_v43 = vld [vmem:[%s2408_s1 + $0x400] sm:$0xff]  ;;  %v349_v12 = vld [vmem:[%s2408_s1 + $0x768] sm:$0xff]  ;;  %v330_v22 = vld [vmem:[%s2408_s1 + $0x6d0] sm:$0xff]  ;;  %v606_v23 = vpack.c.bf16 %v333_v10, %v332_v7 }
  0x4b   :  { %836 = vmatpush.bf16.msra.mxu3 %v590_v47  ;;  %v256_v47 = vld [vmem:[%s2408_s1 + $0x480] sm:$0xff]  ;;  %v560_v57 = vpack.c.bf16 %v241_v44, %v240_v43  ;;  %v346_v25 = vld [vmem:[%s2408_s1 + $0x750] sm:$0xff]  ;;  %v347_v26 = vld [vmem:[%s2408_s1 + $0x758] sm:$0xff] }
  0x4c   :  { %798 = vmatpush.bf16.msra.mxu0 %v565_v53  ;;  %v289_v53 = vld [vmem:[%s2408_s1 + $0x588] sm:$0xff]  ;;  %v568_v61 = vpack.c.bf16 %v257_v48, %v256_v47  ;;  %v362_v28 = vld [vmem:[%s2408_s1 + $0x7d0] sm:$0xff]  ;;  %v363_v29 = vld [vmem:[%s2408_s1 + $0x7d8] sm:$0xff]  ;;  %v613_v37 = vpack.c.bf16 %v347_v26, %v346_v25 }
  0x4d   :  { %811 = vmatpush.bf16.msra.mxu1 %v573_v55  ;;  %v319_v55 = vld [vmem:[%s2408_s1 + $0x678] sm:$0xff]  ;;  %v584_v1 = vpack.c.bf16 %v289_v53, %v288_v52  ;;  %v26_v34 = vld [vmem:[%s2407_s0 + $0x28] sm:$0xff]  ;;  %v312_v38 = vld [vmem:[%s2408_s1 + $0x640] sm:$0xff]  ;;  %v621_v41 = vpack.c.bf16 %v363_v29, %v362_v28 }
  0x4e   :  { %824 = vmatpush.bf16.msra.mxu2 %v581_v56  ;;  %v334_v56 = vld [vmem:[%s2408_s1 + $0x6f0] sm:$0xff]  ;;  %v599_v2 = vpack.c.bf16 %v319_v55, %v318_v54  ;;  %v1874_v35 = vld.sshfl [vmem:[#allocation1 + $0x38] sm:$0xff pattern:$0x73625140]  ;;  %v313_v39 = vld [vmem:[%s2408_s1 + $0x648] sm:$0xff] }
  0x4f   :  { %837 = vmatpush.bf16.msra.mxu3 %v589_v60  ;;  %v351_v60 = vld [vmem:[%s2408_s1 + $0x778] sm:$0xff]  ;;  %v328_v40 = vld [vmem:[%s2408_s1 + $0x6c0] sm:$0xff]  ;;  %v345_v44 = vld [vmem:[%s2408_s1 + $0x748] sm:$0xff]  ;;  %v596_v47 = vpack.c.bf16 %v313_v39, %v312_v38 }
  0x50   :  { %799 = vmatpush.bf16.msra.mxu0 %v564_v3  ;;  %v607_v3 = vpack.c.bf16 %v335_v58, %v334_v56  ;;  %v615_v4 = vpack.c.bf16 %v351_v60, %v350_v59  ;;  %v344_v43 = vld [vmem:[%s2408_s1 + $0x740] sm:$0xff]  ;;  %v311_v51 = vld [vmem:[%s2408_s1 + $0x638] sm:$0xff]  ;;  %v326_v52 = vld [vmem:[%s2408_s1 + $0x6b0] sm:$0xff] }
  0x51   :  { %812 = vmatpush.bf16.msra.mxu1 %v572_v8  ;;  %v623_v8 = vpack.c.bf16 %v367_v0, %v366_v63  ;;  %v612_v49 = vpack.c.bf16 %v345_v44, %v344_v43  ;;  %v327_v54 = vld [vmem:[%s2408_s1 + $0x6b8] sm:$0xff]  ;;  %v342_v55 = vld [vmem:[%s2408_s1 + $0x730] sm:$0xff]  ;;  %v308_v60 = vld [vmem:[%s2408_s1 + $0x620] sm:$0xff] }
  0x52   :  { %825 = vmatpush.bf16.msra.mxu2 %v580_v9  ;;  %v96_v9 = vpack.c.bf16 %v1705_v14, %v1705_v14  ;;  %v97_v14 = vpack.c.bf16 %v1709_v16, %v1709_v16  ;;  %v315_v16 = vld [vmem:[%s2408_s1 + $0x658] sm:$0xff]  ;;  %v309_v63 = vld [vmem:[%s2408_s1 + $0x628] sm:$0xff]  ;;  %v324_v0 = vld [vmem:[%s2408_s1 + $0x6a0] sm:$0xff] }
  0x53   :  { %838 = vmatpush.bf16.msra.mxu3 %v588_v13  ;;  %v98_v13 = vpack.c.bf16 %v1707_v15, %v1707_v15  ;;  %v314_v15 = vld [vmem:[%s2408_s1 + $0x650] sm:$0xff]  ;;  %v343_v56 = vld [vmem:[%s2408_s1 + $0x738] sm:$0xff]  ;;  %v356_v5 = vld [vmem:[%s2408_s1 + $0x7a0] sm:$0xff] }
  0x54   :  { %800 = vmatpush.bf16.msra.mxu0 %v563_v18  ;;  %v364_v18 = vld [vmem:[%s2408_s1 + $0x7e0] sm:$0xff]  ;;  %v597_v33 = vpack.c.bf16 %v315_v16, %v314_v15  ;;  %v359_v58 = vld [vmem:[%s2408_s1 + $0x7b8] sm:$0xff]  ;;  %v357_v6 = vld [vmem:[%s2408_s1 + $0x7a8] sm:$0xff] }
  0x55   :  { %813 = vmatpush.bf16.msra.mxu1 %v571_v19  ;;  %v365_v19 = vld [vmem:[%s2408_s1 + $0x7e8] sm:$0xff] }
  0x56   :  { %826 = vmatpush.bf16.msra.mxu2 %v579_v20  ;;  %v99_v20 = vpack.c.bf16 %v1711_v17, %v1711_v17  ;;  %v331_v17 = vld [vmem:[%s2408_s1 + $0x6d8] sm:$0xff]  ;;  %v622_v27 = vpack.c.bf16 %v365_v19, %v364_v18 }
  0x57   :  { %839 = vmatpush.bf16.msra.mxu3 %v587_v24  ;;  %v614_v24 = vpack.c.bf16 %v349_v12, %v348_v11 }
  0x58   :  { %801 = vmatpush.bf16.msra.mxu0 %v562_v30  ;;  %v1865_v30 = vld.sshfl [vmem:[#allocation1 + $0x20] sm:$0xff pattern:$0x73625140] }
  0x59   :  { %814 = vmatpush.bf16.msra.mxu1 %v570_v31  ;;  %v1867_v31 = vld.sshfl [vmem:[#allocation1 + $0x30] sm:$0xff pattern:$0x73625140] }
  0x5a   :  { %827 = vmatpush.bf16.msra.mxu2 %v578_v32  ;;  %v1869_v32 = vld.sshfl [vmem:[#allocation1 + $0x28] sm:$0xff pattern:$0x73625140] }
  0x5b   :  { %840 = vmatpush.bf16.msra.mxu3 %v586_v36  ;;  %v605_v36 = vpack.c.bf16 %v331_v17, %v330_v22  ;;  %55 = vst [vmem:[#allocation1 + $0x20] ss:$4 sm:$0xff] %v26_v34 }
  0x5c   :  { %802 = vmatpush.bf16.msra.mxu0 %v561_v42  ;;  %v329_v42 = vld [vmem:[%s2408_s1 + $0x6c8] sm:$0xff] }
  0x5d   :  { %815 = vmatpush.bf16.msra.mxu1 %v569_v45  ;;  %v360_v45 = vld [vmem:[%s2408_s1 + $0x7c0] sm:$0xff]  ;;  %v604_v48 = vpack.c.bf16 %v329_v42, %v328_v40 }
  0x5e   :  { %828 = vmatpush.bf16.msra.mxu2 %v577_v46  ;;  %v361_v46 = vld [vmem:[%s2408_s1 + $0x7c8] sm:$0xff] }
  0x5f   :  { %841 = vmatpush.bf16.msra.mxu3 %v585_v50  ;;  %v310_v50 = vld [vmem:[%s2408_s1 + $0x630] sm:$0xff]  ;;  %v620_v53 = vpack.c.bf16 %v361_v46, %v360_v45 }
  0x60   :  { %803 = vmatpush.bf16.msra.mxu0 %v560_v57  ;;  %v358_v57 = vld [vmem:[%s2408_s1 + $0x7b0] sm:$0xff]  ;;  %v595_v59 = vpack.c.bf16 %v311_v51, %v310_v50 }
  0x61   :  { %816 = vmatpush.bf16.msra.mxu1 %v568_v61  ;;  %v603_v61 = vpack.c.bf16 %v327_v54, %v326_v52 }
  0x62   :  { %829 = vmatpush.bf16.msra.mxu2 %v576_v62  ;;  %v611_v62 = vpack.c.bf16 %v343_v56, %v342_v55 }
  0x63   :  { %842 = vmatpush.bf16.msra.mxu3 %v584_v1  ;;  %804 = vmatmul.bf16.vlgmr.msra.gmra.mxu0 %v96_v9  ;;  %v325_v1 = vld [vmem:[%s2408_s1 + $0x6a8] sm:$0xff] }
  0x64   :  { %848 = vmatpush.bf16.msrb.mxu0 %v599_v2  ;;  %817 = vmatmul.bf16.vlgmr.msra.gmra.mxu1 %v97_v14  ;;  %v619_v2 = vpack.c.bf16 %v359_v58, %v358_v57 }
  0x65   :  { %861 = vmatpush.bf16.msrb.mxu1 %v607_v3  ;;  %830 = vmatmul.bf16.vlgmr.msra.gmra.mxu2 %v98_v13  ;;  %v340_v3 = vld [vmem:[%s2408_s1 + $0x720] sm:$0xff] }
  0x66   :  { %874 = vmatpush.bf16.msrb.mxu2 %v615_v4  ;;  %843 = vmatmul.bf16.vlgmr.msra.gmra.mxu3 %v99_v20  ;;  %v341_v4 = vld [vmem:[%s2408_s1 + $0x728] sm:$0xff] }
  0x67   :  { %887 = vmatpush.bf16.msrb.mxu3 %v623_v8 }
  0x68   :  { %849 = vmatpush.bf16.msrb.mxu0 %v598_v21 }
  0x69   :  { %862 = vmatpush.bf16.msrb.mxu1 %v606_v23 }
  0x6a   :  { %875 = vmatpush.bf16.msrb.mxu2 %v614_v24 }
  0x6b   :  { %888 = vmatpush.bf16.msrb.mxu3 %v622_v27 }
  0x6c   :  { %850 = vmatpush.bf16.msrb.mxu0 %v597_v33 }
  0x6d   :  { %863 = vmatpush.bf16.msrb.mxu1 %v605_v36 }
  0x6e   :  { %876 = vmatpush.bf16.msrb.mxu2 %v613_v37 }
  0x6f   :  { %889 = vmatpush.bf16.msrb.mxu3 %v621_v41 }
  0x70   :  { %851 = vmatpush.bf16.msrb.mxu0 %v596_v47 }
  0x71   :  { %864 = vmatpush.bf16.msrb.mxu1 %v604_v48 }
  0x72   :  { %877 = vmatpush.bf16.msrb.mxu2 %v612_v49 }
  0x73   :  { %890 = vmatpush.bf16.msrb.mxu3 %v620_v53 }
  0x74   :  { %10 = vsyncpa [#allocation3], 0  ;;  %852 = vmatpush.bf16.msrb.mxu0 %v595_v59  ;;  %v594_v7 = vpack.c.bf16 %v309_v63, %v308_v60  ;;  %v602_v8 = vpack.c.bf16 %v325_v1, %v324_v0  ;;  %v610_v9 = vpack.c.bf16 %v341_v4, %v340_v3  ;;  %v306_v10 = vld [vmem:[%s2408_s1 + $0x610] sm:$0xff]  ;;  %v307_v11 = vld [vmem:[%s2408_s1 + $0x618] sm:$0xff]  ;;  %v618_v13 = vpack.c.bf16 %v357_v6, %v356_v5  ;;  %s1149_s6 = smov 127   ;;  %s1099_s11 = sshll.u32 %s2412_s5, 4  ;;  %s1100_s11 = int_to_ptr.hbm [resolvable:$true] %s1099_s11 }
  0x75   :  { %865 = vmatpush.bf16.msrb.mxu1 %v603_v61  ;;  %v322_v12 = vld [vmem:[%s2408_s1 + $0x690] sm:$0xff]  ;;  %v323_v14 = vld [vmem:[%s2408_s1 + $0x698] sm:$0xff]  ;;  %v593_v15 = vpack.c.bf16 %v307_v11, %v306_v10  ;;  %v304_v16 = vld [vmem:[%s2408_s1 + $0x600] sm:$0xff]  ;;  %v100_v54 = vpack.c.bf16 %v1865_v30, %v1865_v30  ;;  %v102_v58 = vpack.c.bf16 %v1867_v31, %v1867_v31  ;;  %v101_v30 = vpack.c.bf16 %v1869_v32, %v1869_v32 }
  0x76   :  { %878 = vmatpush.bf16.msrb.mxu2 %v611_v62  ;;  %v338_v18 = vld [vmem:[%s2408_s1 + $0x710] sm:$0xff]  ;;  %v339_v19 = vld [vmem:[%s2408_s1 + $0x718] sm:$0xff]  ;;  %v305_v22 = vld [vmem:[%s2408_s1 + $0x608] sm:$0xff]  ;;  %v601_v23 = vpack.c.bf16 %v323_v14, %v322_v12  ;;  %v103_v61 = vpack.c.bf16 %v1874_v35, %v1874_v35  ;;  %vm1029_vm0 = vcmask 1043456   ;;  %vm1025_vm1 = vcmask 31744  }
  0x77   :  { %891 = vmatpush.bf16.msrb.mxu3 %v619_v2  ;;  %v354_v20 = vld [vmem:[%s2408_s1 + $0x790] sm:$0xff]  ;;  %v355_v21 = vld [vmem:[%s2408_s1 + $0x798] sm:$0xff]  ;;  %v609_v24 = vpack.c.bf16 %v339_v19, %v338_v18  ;;  %v320_v17 = vld [vmem:[%s2408_s1 + $0x680] sm:$0xff]  ;;  %v592_v38 = vpack.c.bf16 %v305_v22, %v304_v16  ;;  %vm1090_vm8 = vcmask 9216  }
  0x78   :  { %853 = vmatpush.bf16.msrb.mxu0 %v594_v7  ;;  %v321_v25 = vld [vmem:[%s2408_s1 + $0x688] sm:$0xff]  ;;  %v336_v26 = vld [vmem:[%s2408_s1 + $0x700] sm:$0xff]  ;;  %v617_v27 = vpack.c.bf16 %v355_v21, %v354_v20  ;;  %v382_v34 = vld [vmem:[%s2408_s1 + $0x870] sm:$0xff] }
  0x79   :  { %866 = vmatpush.bf16.msrb.mxu1 %v602_v8  ;;  %v337_v28 = vld [vmem:[%s2408_s1 + $0x708] sm:$0xff]  ;;  %v352_v29 = vld [vmem:[%s2408_s1 + $0x780] sm:$0xff]  ;;  %v383_v36 = vld [vmem:[%s2408_s1 + $0x878] sm:$0xff]  ;;  %v600_v42 = vpack.c.bf16 %v321_v25, %v320_v17 }
  0x7a   :  { %879 = vmatpush.bf16.msrb.mxu2 %v610_v9  ;;  %v353_v33 = vld [vmem:[%s2408_s1 + $0x788] sm:$0xff]  ;;  %v398_v37 = vld [vmem:[%s2408_s1 + $0x8f0] sm:$0xff]  ;;  %v399_v39 = vld [vmem:[%s2408_s1 + $0x8f8] sm:$0xff]  ;;  %v608_v43 = vpack.c.bf16 %v337_v28, %v336_v26  ;;  %v631_v47 = vpack.c.bf16 %v383_v36, %v382_v34 }
  0x7b   :  { %892 = vmatpush.bf16.msrb.mxu3 %v618_v13  ;;  %v414_v40 = vld [vmem:[%s2408_s1 + $0x970] sm:$0xff]  ;;  %v415_v41 = vld [vmem:[%s2408_s1 + $0x978] sm:$0xff]  ;;  %v616_v46 = vpack.c.bf16 %v353_v33, %v352_v29  ;;  %v639_v48 = vpack.c.bf16 %v399_v39, %v398_v37  ;;  %v380_v50 = vld [vmem:[%s2408_s1 + $0x860] sm:$0xff] }
  0x7c   :  { %854 = vmatpush.bf16.msrb.mxu0 %v593_v15  ;;  %v430_v44 = vld [vmem:[%s2408_s1 + $0x9f0] sm:$0xff]  ;;  %v431_v45 = vld [vmem:[%s2408_s1 + $0x9f8] sm:$0xff]  ;;  %v647_v49 = vpack.c.bf16 %v415_v41, %v414_v40  ;;  %v381_v51 = vld [vmem:[%s2408_s1 + $0x868] sm:$0xff] }
  0x7d   :  { %867 = vmatpush.bf16.msrb.mxu1 %v601_v23  ;;  %v396_v52 = vld [vmem:[%s2408_s1 + $0x8e0] sm:$0xff]  ;;  %v655_v53 = vpack.c.bf16 %v431_v45, %v430_v44  ;;  %v397_v55 = vld [vmem:[%s2408_s1 + $0x8e8] sm:$0xff]  ;;  %v630_v62 = vpack.c.bf16 %v381_v51, %v380_v50  ;;  %v378_v32 = vld [vmem:[%s2408_s1 + $0x850] sm:$0xff] }
  0x7e   :  { %880 = vmatpush.bf16.msrb.mxu2 %v609_v24  ;;  %v412_v56 = vld [vmem:[%s2408_s1 + $0x960] sm:$0xff]  ;;  %v413_v57 = vld [vmem:[%s2408_s1 + $0x968] sm:$0xff]  ;;  %v638_v31 = vpack.c.bf16 %v397_v55, %v396_v52  ;;  %v379_v0 = vld [vmem:[%s2408_s1 + $0x858] sm:$0xff] }
  0x7f   :  { %893 = vmatpush.bf16.msrb.mxu3 %v617_v27  ;;  %v428_v59 = vld [vmem:[%s2408_s1 + $0x9e0] sm:$0xff]  ;;  %v429_v60 = vld [vmem:[%s2408_s1 + $0x9e8] sm:$0xff]  ;;  %v646_v63 = vpack.c.bf16 %v413_v57, %v412_v56  ;;  %v394_v1 = vld [vmem:[%s2408_s1 + $0x8d0] sm:$0xff]  ;;  %v629_v7 = vpack.c.bf16 %v379_v0, %v378_v32 }
  0x80   :  { %855 = vmatpush.bf16.msrb.mxu0 %v592_v38  ;;  %v654_v35 = vpack.c.bf16 %v429_v60, %v428_v59  ;;  %v395_v2 = vld [vmem:[%s2408_s1 + $0x8d8] sm:$0xff]  ;;  %v410_v3 = vld [vmem:[%s2408_s1 + $0x950] sm:$0xff]  ;;  %v376_v10 = vld [vmem:[%s2408_s1 + $0x840] sm:$0xff] }
  0x81   :  { %868 = vmatpush.bf16.msrb.mxu1 %v600_v42  ;;  %v411_v4 = vld [vmem:[%s2408_s1 + $0x958] sm:$0xff]  ;;  %v426_v5 = vld [vmem:[%s2408_s1 + $0x9d0] sm:$0xff]  ;;  %v637_v8 = vpack.c.bf16 %v395_v2, %v394_v1  ;;  %v377_v11 = vld [vmem:[%s2408_s1 + $0x848] sm:$0xff] }
  0x82   :  { %881 = vmatpush.bf16.msrb.mxu2 %v608_v43  ;;  %v427_v6 = vld [vmem:[%s2408_s1 + $0x9d8] sm:$0xff]  ;;  %v645_v9 = vpack.c.bf16 %v411_v4, %v410_v3  ;;  %v392_v12 = vld [vmem:[%s2408_s1 + $0x8c0] sm:$0xff]  ;;  %v393_v14 = vld [vmem:[%s2408_s1 + $0x8c8] sm:$0xff]  ;;  %v628_v15 = vpack.c.bf16 %v377_v11, %v376_v10 }
  0x83   :  { %894 = vmatpush.bf16.msrb.mxu3 %v616_v46  ;;  %856 = vmatmul.bf16.vlgmr.msrb.gmra.mxu0 %v100_v54  ;;  %v653_v13 = vpack.c.bf16 %v427_v6, %v426_v5  ;;  %v408_v18 = vld [vmem:[%s2408_s1 + $0x940] sm:$0xff]  ;;  %v409_v19 = vld [vmem:[%s2408_s1 + $0x948] sm:$0xff]  ;;  %v636_v16 = vpack.c.bf16 %v393_v14, %v392_v12  ;;  %v374_v23 = vld [vmem:[%s2408_s1 + $0x830] sm:$0xff] }
  0x84   :  { %900 = vmatpush.bf16.msra.mxu0 %v631_v47  ;;  %869 = vmatmul.bf16.vlgmr.msrb.gmra.mxu1 %v101_v30  ;;  %v424_v20 = vld [vmem:[%s2408_s1 + $0x9c0] sm:$0xff]  ;;  %v425_v21 = vld [vmem:[%s2408_s1 + $0x9c8] sm:$0xff]  ;;  %v644_v22 = vpack.c.bf16 %v409_v19, %v408_v18  ;;  %v375_v24 = vld [vmem:[%s2408_s1 + $0x838] sm:$0xff] }
  0x85   :  { %913 = vmatpush.bf16.msra.mxu1 %v639_v48  ;;  %882 = vmatmul.bf16.vlgmr.msrb.gmra.mxu2 %v102_v58  ;;  %v390_v17 = vld [vmem:[%s2408_s1 + $0x8b0] sm:$0xff]  ;;  %v652_v25 = vpack.c.bf16 %v425_v21, %v424_v20  ;;  %v391_v26 = vld [vmem:[%s2408_s1 + $0x8b8] sm:$0xff]  ;;  %v627_v34 = vpack.c.bf16 %v375_v24, %v374_v23  ;;  %v372_v38 = vld [vmem:[%s2408_s1 + $0x820] sm:$0xff] }
  0x86   :  { %926 = vmatpush.bf16.msra.mxu2 %v647_v49  ;;  %895 = vmatmul.bf16.vlgmr.msrb.gmra.mxu3 %v103_v61  ;;  %v406_v27 = vld [vmem:[%s2408_s1 + $0x930] sm:$0xff]  ;;  %v407_v28 = vld [vmem:[%s2408_s1 + $0x938] sm:$0xff]  ;;  %v635_v36 = vpack.c.bf16 %v391_v26, %v390_v17  ;;  %v373_v39 = vld [vmem:[%s2408_s1 + $0x828] sm:$0xff] }
  0x87   :  { %939 = vmatpush.bf16.msra.mxu3 %v655_v53  ;;  %v422_v29 = vld [vmem:[%s2408_s1 + $0x9b0] sm:$0xff]  ;;  %v423_v33 = vld [vmem:[%s2408_s1 + $0x9b8] sm:$0xff]  ;;  %v643_v37 = vpack.c.bf16 %v407_v28, %v406_v27  ;;  %v388_v40 = vld [vmem:[%s2408_s1 + $0x8a0] sm:$0xff]  ;;  %v626_v47 = vpack.c.bf16 %v373_v39, %v372_v38 }
  0x88   :  { %901 = vmatpush.bf16.msra.mxu0 %v630_v62  ;;  %v651_v41 = vpack.c.bf16 %v423_v33, %v422_v29  ;;  %v389_v42 = vld [vmem:[%s2408_s1 + $0x8a8] sm:$0xff]  ;;  %v404_v43 = vld [vmem:[%s2408_s1 + $0x920] sm:$0xff]  ;;  %v370_v50 = vld [vmem:[%s2408_s1 + $0x810] sm:$0xff] }
  0x89   :  { %914 = vmatpush.bf16.msra.mxu1 %v638_v31  ;;  %v405_v44 = vld [vmem:[%s2408_s1 + $0x928] sm:$0xff]  ;;  %v420_v45 = vld [vmem:[%s2408_s1 + $0x9a0] sm:$0xff]  ;;  %v634_v48 = vpack.c.bf16 %v389_v42, %v388_v40  ;;  %v371_v51 = vld [vmem:[%s2408_s1 + $0x818] sm:$0xff] }
  0x8a   :  { %927 = vmatpush.bf16.msra.mxu2 %v646_v63  ;;  %v421_v46 = vld [vmem:[%s2408_s1 + $0x9a8] sm:$0xff]  ;;  %v642_v49 = vpack.c.bf16 %v405_v44, %v404_v43  ;;  %v386_v52 = vld [vmem:[%s2408_s1 + $0x890] sm:$0xff]  ;;  %v387_v54 = vld [vmem:[%s2408_s1 + $0x898] sm:$0xff]  ;;  %v625_v59 = vpack.c.bf16 %v371_v51, %v370_v50 }
  0x8b   :  { %940 = vmatpush.bf16.msra.mxu3 %v654_v35  ;;  %v650_v53 = vpack.c.bf16 %v421_v46, %v420_v45  ;;  %v402_v55 = vld [vmem:[%s2408_s1 + $0x910] sm:$0xff]  ;;  %v403_v56 = vld [vmem:[%s2408_s1 + $0x918] sm:$0xff]  ;;  %v368_v30 = vld [vmem:[%s2408_s1 + $0x800] sm:$0xff]  ;;  %v633_v31 = vpack.c.bf16 %v387_v54, %v386_v52 }
  0x8c   :  { %902 = vmatpush.bf16.msra.mxu0 %v629_v7  ;;  %v418_v57 = vld [vmem:[%s2408_s1 + $0x990] sm:$0xff]  ;;  %v419_v58 = vld [vmem:[%s2408_s1 + $0x998] sm:$0xff]  ;;  %v369_v60 = vld [vmem:[%s2408_s1 + $0x808] sm:$0xff]  ;;  %v641_v63 = vpack.c.bf16 %v403_v56, %v402_v55 }
  0x8d   :  { %915 = vmatpush.bf16.msra.mxu1 %v637_v8  ;;  %v384_v61 = vld [vmem:[%s2408_s1 + $0x880] sm:$0xff]  ;;  %v385_v62 = vld [vmem:[%s2408_s1 + $0x888] sm:$0xff]  ;;  %v649_v35 = vpack.c.bf16 %v419_v58, %v418_v57  ;;  %v446_v3 = vld [vmem:[%s2408_s1 + $0xa70] sm:$0xff]  ;;  %v624_v8 = vpack.c.bf16 %v369_v60, %v368_v30 }
  0x8e   :  { %928 = vmatpush.bf16.msra.mxu2 %v645_v9  ;;  %v400_v32 = vld [vmem:[%s2408_s1 + $0x900] sm:$0xff]  ;;  %v401_v0 = vld [vmem:[%s2408_s1 + $0x908] sm:$0xff]  ;;  %v447_v4 = vld [vmem:[%s2408_s1 + $0xa78] sm:$0xff]  ;;  %v632_v12 = vpack.c.bf16 %v385_v62, %v384_v61 }
  0x8f   :  { %941 = vmatpush.bf16.msra.mxu3 %v653_v13  ;;  %v416_v1 = vld [vmem:[%s2408_s1 + $0x980] sm:$0xff]  ;;  %v417_v2 = vld [vmem:[%s2408_s1 + $0x988] sm:$0xff]  ;;  %v462_v5 = vld [vmem:[%s2408_s1 + $0xaf0] sm:$0xff]  ;;  %v640_v13 = vpack.c.bf16 %v401_v0, %v400_v32  ;;  %v663_v20 = vpack.c.bf16 %v447_v4, %v446_v3 }
  0x90   :  { %903 = vmatpush.bf16.msra.mxu0 %v628_v15  ;;  %v463_v6 = vld [vmem:[%s2408_s1 + $0xaf8] sm:$0xff]  ;;  %v478_v7 = vld [vmem:[%s2408_s1 + $0xb70] sm:$0xff]  ;;  %v56_v14 = vld.sshfl [vmem:[#allocation1] sm:$0xff pattern:$0x73625140]  ;;  %v648_v19 = vpack.c.bf16 %v417_v2, %v416_v1 }
  0x91   :  { %916 = vmatpush.bf16.msra.mxu1 %v636_v16  ;;  %v479_v9 = vld [vmem:[%s2408_s1 + $0xb78] sm:$0xff]  ;;  %v494_v10 = vld [vmem:[%s2408_s1 + $0xbf0] sm:$0xff]  ;;  %v57_v21 = vld.sshfl [vmem:[#allocation1 + $0x8] sm:$0xff pattern:$0x73625140]  ;;  %v671_v16 = vpack.c.bf16 %v463_v6, %v462_v5  ;;  %v104_v26 = vpack.c.bf16 %v56_v14, %v56_v14 }
  0x92   :  { %929 = vmatpush.bf16.msra.mxu2 %v644_v22  ;;  %v495_v11 = vld [vmem:[%s2408_s1 + $0xbf8] sm:$0xff]  ;;  %v58_v18 = vld.sshfl [vmem:[#allocation1 + $0x10] sm:$0xff pattern:$0x73625140]  ;;  %v679_v22 = vpack.c.bf16 %v479_v9, %v478_v7  ;;  %v444_v23 = vld [vmem:[%s2408_s1 + $0xa60] sm:$0xff] }
  0x93   :  { %942 = vmatpush.bf16.msra.mxu3 %v652_v25  ;;  %v59_v15 = vld.sshfl [vmem:[#allocation1 + $0x18] sm:$0xff pattern:$0x73625140]  ;;  %v445_v24 = vld [vmem:[%s2408_s1 + $0xa68] sm:$0xff]  ;;  %v460_v17 = vld [vmem:[%s2408_s1 + $0xae0] sm:$0xff]  ;;  %v687_v25 = vpack.c.bf16 %v495_v11, %v494_v10  ;;  %v106_v33 = vpack.c.bf16 %v58_v18, %v58_v18 }
  0x94   :  { %904 = vmatpush.bf16.msra.mxu0 %v627_v34  ;;  %v461_v27 = vld [vmem:[%s2408_s1 + $0xae8] sm:$0xff]  ;;  %v476_v28 = vld [vmem:[%s2408_s1 + $0xb60] sm:$0xff]  ;;  %v105_v34 = vpack.c.bf16 %v57_v21, %v57_v21  ;;  %v107_v38 = vpack.c.bf16 %v59_v15, %v59_v15  ;;  %v662_v39 = vpack.c.bf16 %v445_v24, %v444_v23  ;;  %v442_v42 = vld [vmem:[%s2408_s1 + $0xa50] sm:$0xff] }
  0x95   :  { %917 = vmatpush.bf16.msra.mxu1 %v635_v36  ;;  %v477_v29 = vld [vmem:[%s2408_s1 + $0xb68] sm:$0xff]  ;;  %v492_v36 = vld [vmem:[%s2408_s1 + $0xbe0] sm:$0xff]  ;;  %v670_v40 = vpack.c.bf16 %v461_v27, %v460_v17  ;;  %v443_v43 = vld [vmem:[%s2408_s1 + $0xa58] sm:$0xff] }
  0x96   :  { %930 = vmatpush.bf16.msra.mxu2 %v643_v37  ;;  %v493_v37 = vld [vmem:[%s2408_s1 + $0xbe8] sm:$0xff]  ;;  %v458_v44 = vld [vmem:[%s2408_s1 + $0xad0] sm:$0xff]  ;;  %v459_v46 = vld [vmem:[%s2408_s1 + $0xad8] sm:$0xff]  ;;  %v661_v51 = vpack.c.bf16 %v443_v43, %v442_v42 }
  0x97   :  { %943 = vmatpush.bf16.msra.mxu3 %v651_v41  ;;  %v678_v41 = vpack.c.bf16 %v477_v29, %v476_v28  ;;  %v686_v45 = vpack.c.bf16 %v493_v37, %v492_v36  ;;  %v491_v50 = vld [vmem:[%s2408_s1 + $0xbd8] sm:$0xff]  ;;  %v669_v52 = vpack.c.bf16 %v459_v46, %v458_v44  ;;  %v440_v54 = vld [vmem:[%s2408_s1 + $0xa40] sm:$0xff]  ;;  %v441_v55 = vld [vmem:[%s2408_s1 + $0xa48] sm:$0xff] }
  0x98   :  { %905 = vmatpush.bf16.msra.mxu0 %v626_v47  ;;  %v474_v47 = vld [vmem:[%s2408_s1 + $0xb50] sm:$0xff]  ;;  %v456_v56 = vld [vmem:[%s2408_s1 + $0xac0] sm:$0xff]  ;;  %v457_v58 = vld [vmem:[%s2408_s1 + $0xac8] sm:$0xff]  ;;  %v660_v62 = vpack.c.bf16 %v441_v55, %v440_v54 }
  0x99   :  { %918 = vmatpush.bf16.msra.mxu1 %v634_v48  ;;  %v475_v48 = vld [vmem:[%s2408_s1 + $0xb58] sm:$0xff]  ;;  %v472_v30 = vld [vmem:[%s2408_s1 + $0xb40] sm:$0xff]  ;;  %v489_v61 = vld [vmem:[%s2408_s1 + $0xbc8] sm:$0xff] }
  0x9a   :  { %931 = vmatpush.bf16.msra.mxu2 %v642_v49  ;;  %v490_v49 = vld [vmem:[%s2408_s1 + $0xbd0] sm:$0xff]  ;;  %v488_v60 = vld [vmem:[%s2408_s1 + $0xbc0] sm:$0xff]  ;;  %v439_v0 = vld [vmem:[%s2408_s1 + $0xa38] sm:$0xff] }
  0x9b   :  { %944 = vmatpush.bf16.msra.mxu3 %v650_v53  ;;  %v677_v53 = vpack.c.bf16 %v475_v48, %v474_v47  ;;  %v685_v57 = vpack.c.bf16 %v491_v50, %v490_v49  ;;  %v438_v32 = vld [vmem:[%s2408_s1 + $0xa30] sm:$0xff]  ;;  %v455_v2 = vld [vmem:[%s2408_s1 + $0xab8] sm:$0xff]  ;;  %v437_v11 = vld [vmem:[%s2408_s1 + $0xa28] sm:$0xff] }
  0x9c   :  { %906 = vmatpush.bf16.msra.mxu0 %v625_v59  ;;  %v473_v59 = vld [vmem:[%s2408_s1 + $0xb48] sm:$0xff]  ;;  %v454_v1 = vld [vmem:[%s2408_s1 + $0xab0] sm:$0xff]  ;;  %v471_v4 = vld [vmem:[%s2408_s1 + $0xb38] sm:$0xff]  ;;  %v659_v7 = vpack.c.bf16 %v439_v0, %v438_v32 }
  0x9d   :  { %919 = vmatpush.bf16.msra.mxu1 %v633_v31  ;;  %v668_v31 = vpack.c.bf16 %v457_v58, %v456_v56  ;;  %v470_v3 = vld [vmem:[%s2408_s1 + $0xb30] sm:$0xff]  ;;  %v487_v6 = vld [vmem:[%s2408_s1 + $0xbb8] sm:$0xff]  ;;  %v667_v9 = vpack.c.bf16 %v455_v2, %v454_v1  ;;  %v1121_v21 = vld [vmem:[%s2410_s3] sm:$0xf] }
  0x9e   :  { %932 = vmatpush.bf16.msra.mxu2 %v641_v63  ;;  %v676_v63 = vpack.c.bf16 %v473_v59, %v472_v30  ;;  %v486_v5 = vld [vmem:[%s2408_s1 + $0xbb0] sm:$0xff]  ;;  %v675_v10 = vpack.c.bf16 %v471_v4, %v470_v3  ;;  %v1008_v14 = vpop.permute.xlu0 %1007  ;;  %v485_v23 = vld [vmem:[%s2408_s1 + $0xba8] sm:$0xff]  ;;  %v435_v27 = vld [vmem:[%s2408_s1 + $0xa18] sm:$0xff] }
  0x9f   :  { %945 = vmatpush.bf16.msra.mxu3 %v649_v35  ;;  %v684_v35 = vpack.c.bf16 %v489_v61, %v488_v60  ;;  %v683_v18 = vpack.c.bf16 %v487_v6, %v486_v5  ;;  %v1010_v15 = vsub.f32 %v1121_v21, %v1008_v14  ;;  %v434_v17 = vld [vmem:[%s2408_s1 + $0xa10] sm:$0xff]  ;;  %v1116_v29 = vld [vmem:[%s2409_s2] ss:$0 sm:$0xff]  ;;  %v467_v37 = vld [vmem:[%s2408_s1 + $0xb18] sm:$0xff] }
  0xa0   :  { %907 = vmatpush.bf16.msra.mxu0 %v624_v8  ;;  %v436_v8 = vld [vmem:[%s2408_s1 + $0xa20] sm:$0xff]  ;;  %v450_v28 = vld [vmem:[%s2408_s1 + $0xa90] sm:$0xff]  ;;  %v449_v49 = vld [vmem:[%s2408_s1 + $0xa88] sm:$0xff] }
  0xa1   :  { %920 = vmatpush.bf16.msra.mxu1 %v632_v12  ;;  %v452_v12 = vld [vmem:[%s2408_s1 + $0xaa0] sm:$0xff]  ;;  %v658_v24 = vpack.c.bf16 %v437_v11, %v436_v8  ;;  %1020 = vrot.lane.b32.xlu0 %v1010_v15, %s1149_s6  ;;  %v466_v36 = vld [vmem:[%s2408_s1 + $0xb10] sm:$0xff]  ;;  %v61_v59 = vld.sshfl [vmem:[#allocation1 + $0x28] sm:$0xff pattern:$0x73625140] }
  0xa2   :  { %933 = vmatpush.bf16.msra.mxu2 %v640_v13  ;;  %v453_v13 = vld [vmem:[%s2408_s1 + $0xaa8] sm:$0xff]  ;;  %v673_v43 = vpack.c.bf16 %v467_v37, %v466_v36  ;;  %v432_v44 = vld [vmem:[%s2408_s1 + $0xa00] sm:$0xff]  ;;  %v62_v60 = vld.sshfl [vmem:[#allocation1 + $0x30] sm:$0xff pattern:$0x73625140]  ;;  %v109_v1 = vpack.c.bf16 %v61_v59, %v61_v59 }
  0xa3   :  { %946 = vmatpush.bf16.msra.mxu3 %v648_v19  ;;  %908 = vmatmul.bf16.vlgmr.msra.gmra.mxu0 %v104_v26  ;;  %v468_v19 = vld [vmem:[%s2408_s1 + $0xb20] sm:$0xff] }
  0xa4   :  { %952 = vmatpush.bf16.msrb.mxu0 %v663_v20  ;;  %921 = vmatmul.bf16.vlgmr.msra.gmra.mxu1 %v105_v34  ;;  %v469_v20 = vld [vmem:[%s2408_s1 + $0xb28] sm:$0xff]  ;;  %v451_v34 = vld [vmem:[%s2408_s1 + $0xa98] sm:$0xff]  ;;  %v448_v46 = vld [vmem:[%s2408_s1 + $0xa80] sm:$0xff] }
  0xa5   :  { %965 = vmatpush.bf16.msrb.mxu1 %v671_v16  ;;  %934 = vmatmul.bf16.vlgmr.msra.gmra.mxu2 %v106_v33  ;;  %v2340_v16 = vld [vmem:[%s2411_s4] sm:$0x1]  ;;  %v674_v26 = vpack.c.bf16 %v469_v20, %v468_v19  ;;  %v665_v42 = vpack.c.bf16 %v451_v34, %v450_v28  ;;  %v664_v58 = vpack.c.bf16 %v449_v49, %v448_v46 }
  0xa6   :  { %978 = vmatpush.bf16.msrb.mxu2 %v679_v22  ;;  %947 = vmatmul.bf16.vlgmr.msra.gmra.mxu3 %v107_v38  ;;  %v484_v22 = vld [vmem:[%s2408_s1 + $0xba0] sm:$0xff]  ;;  %v482_v38 = vld [vmem:[%s2408_s1 + $0xb90] sm:$0xff] }
  0xa7   :  { %991 = vmatpush.bf16.msrb.mxu3 %v687_v25  ;;  %1013 = vrot.lane.b32.xlu1 %v2340_v16, %s1148_s18  ;;  %v666_v25 = vpack.c.bf16 %v453_v13, %v452_v12  ;;  %v682_v33 = vpack.c.bf16 %v485_v23, %v484_v22  ;;  %v464_v50 = vld [vmem:[%s2408_s1 + $0xb00] sm:$0xff] }
  0xa8   :  { %953 = vmatpush.bf16.msrb.mxu0 %v662_v39  ;;  %v483_v39 = vld [vmem:[%s2408_s1 + $0xb98] sm:$0xff]  ;;  %v714_v54 = vpop.f32.mrf.mxu1  ;;  %v60_v56 = vld.sshfl [vmem:[#allocation1 + $0x20] sm:$0xff pattern:$0x73625140] }
  0xa9   :  { %966 = vmatpush.bf16.msrb.mxu1 %v670_v40  ;;  %v657_v40 = vpack.c.bf16 %v435_v27, %v434_v17  ;;  %v681_v48 = vpack.c.bf16 %v483_v39, %v482_v38 }
  0xaa   :  { %979 = vmatpush.bf16.msrb.mxu2 %v678_v41  ;;  %v701_v41 = vpop.f32.mrf.mxu0 }
  0xab   :  { %992 = vmatpush.bf16.msrb.mxu3 %v686_v45  ;;  %v433_v45 = vld [vmem:[%s2408_s1 + $0xa08] sm:$0xff]  ;;  %v702_v47 = vadd.f32 %v1116_v29, %v701_v41 }
  0xac   :  { %954 = vmatpush.bf16.msrb.mxu0 %v661_v51  ;;  %v465_v51 = vld [vmem:[%s2408_s1 + $0xb08] sm:$0xff]  ;;  %v656_v55 = vpack.c.bf16 %v433_v45, %v432_v44 }
  0xad   :  { %967 = vmatpush.bf16.msrb.mxu1 %v669_v52  ;;  %v480_v52 = vld [vmem:[%s2408_s1 + $0xb80] sm:$0xff]  ;;  %v672_v30 = vpack.c.bf16 %v465_v51, %v464_v50  ;;  %v740_v0 = vpop.f32.mrf.mxu3 }
  0xae   :  { %980 = vmatpush.bf16.msrb.mxu2 %v677_v53  ;;  %v481_v53 = vld [vmem:[%s2408_s1 + $0xb88] sm:$0xff]  ;;  %s1151_s1 = smov [#allocation2]  }
  0xaf   :  { %993 = vmatpush.bf16.msrb.mxu3 %v685_v57  ;;  %v715_v57 = vadd.f32 %v714_v54, %v702_v47  ;;  %v680_v61 = vpack.c.bf16 %v481_v53, %v480_v52 }
  0xb0   :  { %955 = vmatpush.bf16.msrb.mxu0 %v660_v62  ;;  %v63_v62 = vld.sshfl [vmem:[#allocation1 + $0x38] sm:$0xff pattern:$0x73625140]  ;;  %v716_v5 = vpop.f32.mrf.mxu1 }
  0xb1   :  { %968 = vmatpush.bf16.msrb.mxu1 %v668_v31  ;;  %v727_v31 = vpop.f32.mrf.mxu2  ;;  %v111_v3 = vpack.c.bf16 %v63_v62, %v63_v62 }
  0xb2   :  { %981 = vmatpush.bf16.msrb.mxu2 %v676_v63  ;;  %v108_v63 = vpack.c.bf16 %v60_v56, %v60_v56  ;;  %v728_v32 = vadd.f32 %v727_v31, %v715_v57  ;;  %v703_v2 = vpop.f32.mrf.mxu0 }
  0xb3   :  { %994 = vmatpush.bf16.msrb.mxu3 %v684_v35  ;;  %v110_v35 = vpack.c.bf16 %v62_v60, %v62_v60 }
  0xb4   :  { %956 = vmatpush.bf16.msrb.mxu0 %v659_v7  ;;  %v741_v4 = vadd.f32 %v740_v0, %v728_v32 }
  0xb5   :  { %969 = vmatpush.bf16.msrb.mxu1 %v667_v9  ;;  %v742_v7 = vpop.f32.mrf.mxu3 }
  0xb6   :  { %982 = vmatpush.bf16.msrb.mxu2 %v675_v10 }
  0xb7   :  { %995 = vmatpush.bf16.msrb.mxu3 %v683_v18 }
  0xb8   :  { %957 = vmatpush.bf16.msrb.mxu0 %v658_v24 }
  0xb9   :  { %970 = vmatpush.bf16.msrb.mxu1 %v666_v25  ;;  %v729_v6 = vpop.f32.mrf.mxu2 }
  0xba   :  { %983 = vmatpush.bf16.msrb.mxu2 %v674_v26 }
  0xbb   :  { %996 = vmatpush.bf16.msrb.mxu3 %v682_v33 }
  0xbc   :  { %958 = vmatpush.bf16.msrb.mxu0 %v657_v40 }
  0xbd   :  { %971 = vmatpush.bf16.msrb.mxu1 %v665_v42 }
  0xbe   :  { %984 = vmatpush.bf16.msrb.mxu2 %v673_v43 }
  0xbf   :  { %997 = vmatpush.bf16.msrb.mxu3 %v681_v48 }
  0xc0   :  { %959 = vmatpush.bf16.msrb.mxu0 %v656_v55  ;;  %v753_v8 = vpop.f32.mrf.mxu0 }
  0xc1   :  { %972 = vmatpush.bf16.msrb.mxu1 %v664_v58  ;;  %v754_v9 = vadd.f32 %v753_v8, %v741_v4  ;;  %v766_v10 = vpop.f32.mrf.mxu1 }
  0xc2   :  { %985 = vmatpush.bf16.msrb.mxu2 %v672_v30 }
  0xc3   :  { %998 = vmatpush.bf16.msrb.mxu3 %v680_v61  ;;  %960 = vmatmul.bf16.vlgmr.msrb.gmra.mxu0 %v108_v63  ;;  %v767_v11 = vadd.f32 %v766_v10, %v754_v9  ;;  %v1150_v9 = vmov 0  }
  0xc4   :  { %973 = vmatmul.bf16.vlgmr.msrb.gmra.mxu1 %v109_v1  ;;  %1114 = vset.pattern.permute.xlu2 %v1150_v9 }
  0xc5   :  { %986 = vmatmul.bf16.vlgmr.msrb.gmra.mxu2 %v110_v35  ;;  %1115 = vset.pattern.permute.xlu0 %v1150_v9 }
  0xc6   :  { %999 = vmatmul.bf16.vlgmr.msrb.gmra.mxu3 %v111_v3 }
  0xc8   :  { %v779_v12 = vpop.f32.mrf.mxu2  ;;  %v755_v19 = vpop.f32.mrf.mxu0 }
  0xc9   :  { %v780_v13 = vadd.f32 %v779_v12, %v767_v11  ;;  %v792_v14 = vpop.f32.mrf.mxu3  ;;  %v768_v20 = vpop.f32.mrf.mxu1 }
  0xcb   :  { %v793_v18 = vadd.f32 %v792_v14, %v780_v13 }
  0xd0   :  { %v781_v21 = vpop.f32.mrf.mxu2 }
  0xd1   :  { %v794_v15 = vpop.f32.mrf.mxu3 }
  0xe0   :  { %v805_v22 = vpop.f32.mrf.mxu0 }
  0xe1   :  { %v806_v23 = vadd.f32 %v805_v22, %v793_v18  ;;  %v818_v24 = vpop.f32.mrf.mxu1 }
  0xe3   :  { %v819_v17 = vadd.f32 %v818_v24, %v806_v23 }
  0xe8   :  { %v831_v25 = vpop.f32.mrf.mxu2  ;;  %v807_v28 = vpop.f32.mrf.mxu0 }
  0xe9   :  { %v832_v26 = vadd.f32 %v831_v25, %v819_v17  ;;  %v844_v27 = vpop.f32.mrf.mxu3  ;;  %v820_v29 = vpop.f32.mrf.mxu1 }
  0xeb   :  { %v845_v33 = vadd.f32 %v844_v27, %v832_v26 }
  0xf0   :  { %v833_v34 = vpop.f32.mrf.mxu2 }
  0xf1   :  { %v846_v36 = vpop.f32.mrf.mxu3 }
  0xf2   :  { %v1076_v36 = vlaneseq }
 0x100   :  { %v857_v37 = vpop.f32.mrf.mxu0 }
 0x101   :  { %v870_v38 = vpop.f32.mrf.mxu1  ;;  %v858_v48 = vadd.f32 %v857_v37, %v845_v33 }
 0x103   :  { %v871_v53 = vadd.f32 %v870_v38, %v858_v48  ;;  %v1077_v38 = vand.u32 127, %v1076_v36 }
 0x105   :  { %vm1078_vm7 = vcmp.eq.s32.totalorder %v1077_v38, 0 }
 0x108   :  { %v883_v39 = vpop.f32.mrf.mxu2  ;;  %v859_v41 = vpop.f32.mrf.mxu0 }
 0x109   :  { %v896_v40 = vpop.f32.mrf.mxu3  ;;  %v872_v42 = vpop.f32.mrf.mxu1  ;;  %v884_v54 = vadd.f32 %v883_v39, %v871_v53 }
 0x10b   :  { %v897_v59 = vadd.f32 %v896_v40, %v884_v54 }
 0x110   :  { %v885_v43 = vpop.f32.mrf.mxu2 }
 0x111   :  { %v898_v44 = vpop.f32.mrf.mxu3 }
 0x113   :  { %v1021_v47 = vpop.permute.xlu0 %1020 }
 0x114   :  { %1108 = vmatpush.msk.msra.mxu0 %vm1029_vm0, %v1021_v47 }
 0x119   :  { %v1014_v55 = vpop.permute.xlu1 %1013 }
 0x11a   :  { %v1016_v56 = vsub.f32 %v2340_v16, %v1014_v55 }
 0x11c   :  { %v1018_v30 = vperm.slane %v1016_v56, 0 }
 0x11e   :  { %1022 = vrot.lane.b32.xlu1 %v1018_v30, %s1149_s6  ;;  %s1097_s6 = sshll.u32 %s1151_s1, 4  ;;  %s1098_s6 = int_to_ptr.vmem [resolvable:$true] %s1097_s6 }
 0x120   :  { %v909_v45 = vpop.f32.mrf.mxu0 }
 0x121   :  { %v922_v46 = vpop.f32.mrf.mxu1  ;;  %v910_v60 = vadd.f32 %v909_v45, %v897_v59 }
 0x123   :  { %v923_v61 = vadd.f32 %v922_v46, %v910_v60 }
 0x128   :  { %v935_v49 = vpop.f32.mrf.mxu2  ;;  %v911_v51 = vpop.f32.mrf.mxu0 }
 0x129   :  { %v948_v50 = vpop.f32.mrf.mxu3  ;;  %v924_v52 = vpop.f32.mrf.mxu1  ;;  %v936_v62 = vadd.f32 %v935_v49, %v923_v61 }
 0x12b   :  { %v949_v31 = vadd.f32 %v948_v50, %v936_v62 }
 0x130   :  { %v937_v57 = vpop.f32.mrf.mxu2 }
 0x131   :  { %v950_v58 = vpop.f32.mrf.mxu3 }
 0x140   :  { %v961_v63 = vpop.f32.mrf.mxu0 }
 0x141   :  { %v974_v32 = vpop.f32.mrf.mxu1  ;;  %v962_v0 = vadd.f32 %v961_v63, %v949_v31 }
 0x143   :  { %v975_v1 = vadd.f32 %v974_v32, %v962_v0 }
 0x148   :  { %v987_v35 = vpop.f32.mrf.mxu2  ;;  %v963_v4 = vpop.f32.mrf.mxu0 }
 0x149   :  { %v988_v2 = vadd.f32 %v987_v35, %v975_v1  ;;  %v1000_v3 = vpop.f32.mrf.mxu3  ;;  %v976_v5 = vpop.f32.mrf.mxu1 }
 0x14b   :  { %v1001_v16 = vadd.f32 %v1000_v3, %v988_v2 }
 0x14d   :  { %v1004_v6 = vmax.f32 %v1001_v16, 0.0 }
 0x14f   :  { %1109 = vmatmul.msk.f32.vlgmr.msra.gmra.mxu0 %vm1025_vm1, %v1004_v6 }
 0x150   :  { %v989_v7 = vpop.f32.mrf.mxu2 }
 0x151   :  { %v1002_v8 = vpop.f32.mrf.mxu3 }
 0x190   :  { %v1023_v10 = vpop.permute.xlu1 %1022 }
 0x1cc   :  { %v1049_v11 = vpop.f32.mrf.mxu0 }
 0x1cd   :  { %v1050_v12 = vadd.f32 %v1049_v11, %v1023_v10 }
 0x1cf   :  { %v1052_v13 = vand.u32 2147483647, %v1050_v12  ;;  %vm1073_vm6 = vcmp.ge.f32.partialorder %v1050_v12, 0.0 }
 0x1d1   :  { %v1053_v14 = vsub.f32 0.0, %v1052_v13 }
 0x1d3   :  { %v1054_v18 = vmul.f32 1.442695, %v1053_v14 }
 0x1d5   :  { %1117 = vpow2.f32 %v1054_v18 }
 0x1db   :  { %v1118_v19 = vpop.eup %1117 }
 0x1dc   :  { %v1056_v20 = vadd.f32 1.0, %v1118_v19 }
 0x1de   :  { %1119 = vrcp.f32 %v1056_v20  ;;  %v1068_v23 = vand.u32 2147483648, %v1056_v20  ;;  %v1066_v17 = vand.u32 2147483647, %v1056_v20  ;;  %vm1062_vm3 = vweird.f32 %v1056_v20 }
 0x1e0   :  { %v1069_v26 = vor.u32 1.1754944e-38, %v1068_v23  ;;  %vm1067_vm5 = vcmp.eq.f32.partialorder %v1066_v17, 8.507059e+37 }
 0x1e4   :  { %v1120_v21 = vpop.eup %1119 }
 0x1e5   :  { %v1058_v15 = vmul.f32 %v1120_v21, %v1056_v20  ;;  %vm1063_vm2 = vweird.f32 %v1120_v21 }
 0x1e6   :  { %vm1064_vm4 = vmor %vm1062_vm3, %vm1063_vm2 }
 0x1e7   :  { %v1059_v22 = vsub.f32 1.0, %v1058_v15 }
 0x1e9   :  { %v1060_v24 = vmul.f32 %v1120_v21, %v1059_v22 }
 0x1eb   :  { %v1061_v25 = vadd.f32 %v1120_v21, %v1060_v24 }
 0x1ed   :  { %v1065_v27 = vsel %vm1064_vm4, %v1120_v21, %v1061_v25 }
 0x1ee   :  { %v1070_v28 = vsel %vm1067_vm5, %v1069_v26, %v1065_v27 }
 0x1ef   :  { %v1072_v29 = vmul.f32 %v1118_v19, %v1070_v28 }
 0x1f1   :  { %v1074_v33 = vsel %vm1073_vm6, %v1072_v29, %v1070_v28  ;;  %v1075_v34 = vsel %vm1073_vm6, %v1070_v28, %v1072_v29 }
 0x1f2   :  { %1081 = vperm.xlu2 %1114, %v1074_v33  }
 0x1fa   :  { %1086 = vperm.xlu2 %1114, %v1075_v34  }
 0x24c   :  { %v1082_v37 = vpop.permute.xlu2 %1081 }
 0x254   :  { %v1087_v39 = vpop.permute.xlu2 %1086 }
 0x255   :  { %v1089_v40 = vsel %vm1078_vm7, %v1082_v37, %v1087_v39 }
 0x256   :  { %1091 = vst.msk [vmem:[#allocation2] sm:$0x3] %vm1090_vm8, %v1089_v40 }
 0x257   :  { %1102 = dma.vmem_to_hbm [thread:$0]  %s1098_s6, 32, %s1100_s11, [#allocation3]  }
 0x258   :  { %1146 = dma.done.wait [#allocation3], 32  }
 0x259   :  { %1147 = vsyncadd [#allocation3], 4294967264 }
 0x25a   :  { %1107 = vsyncpa [#allocation3], 1 }

</bundles_post_ra>
